<compile_context>
chip_gen: v6e
topology: v6e:2x2x1
jax: 0.10.0
libtpu: 0.0.40
codegen_flags: <defaults>
</compile_context>

<pallas_src>
import math
import jax
import jax.numpy as jnp
from jax.experimental import pallas as pl
from jax.experimental.pallas import tpu as pltpu

# Small, module-consistent sizes (config defaults are 256/8/1024; scaled down).
B, N, D_MODEL, N_HEAD, D_FFN = 2, 8, 32, 4, 64
HEAD_DIM = D_MODEL // N_HEAD
LN_EPS = 1e-5
F32 = jnp.float32
BF16 = jnp.bfloat16


def _layer_norm(y, gamma, beta):
    mu = jnp.mean(y, axis=-1, keepdims=True)
    var = jnp.mean((y - mu) ** 2, axis=-1, keepdims=True)
    return (y - mu) * jax.lax.rsqrt(var + LN_EPS) * gamma + beta


def _gelu(x):
    # TODO(synk): torch nn.GELU default is erf-based; tanh approximation used here.
    c = math.sqrt(2.0 / math.pi)
    return 0.5 * x * (1.0 + jnp.tanh(c * (x + 0.044715 * x * x * x)))


def gtmgc_block_kernel(x_ref, bias_ref,
                       wq_ref, wk_ref, wv_ref, bq_ref, bk_ref, bv_ref,
                       wo_ref, bo_ref, g1_ref, be1_ref,
                       w1_ref, b1_ref, w2_ref, b2_ref, g2_ref, be2_ref,
                       out_ref, attn_ref):
    BH = B * N_HEAD

    x = x_ref[...]                     # (B, N, D) f32 (kept f32 for residuals)
    x_bf = x.astype(BF16)

    # Replicate nodes per head -> one rank-3 batched matmul per projection,
    # batch axis = B*H.  Only leading-dim broadcasts/reshapes (last two dims
    # untouched), so no lane slicing, no concat, no relayout-heavy transposes.
    x_bh = jnp.broadcast_to(x_bf[:, None], (B, N_HEAD, N, D_MODEL)
                            ).reshape(BH, N, D_MODEL)

    def per_head_w(ref):               # (H, d_in, d_out) bf16 -> (B*H, d_in, d_out)
        w = ref[...]
        return jnp.broadcast_to(w[None], (B,) + w.shape).reshape((BH,) + w.shape[1:])

    def per_head_b(ref):               # (H, 1, dh) f32 -> (B*H, 1, dh)
        bb = ref[...]
        return jnp.broadcast_to(bb[None], (B,) + bb.shape).reshape((BH,) + bb.shape[1:])

    # ---- QKV projections: bf16 MXU matmuls, f32 accumulation ----------------
    qh = jnp.einsum("bnd,bde->bne", x_bh, per_head_w(wq_ref),
                    preferred_element_type=F32) + per_head_b(bq_ref)
    kh = jnp.einsum("bnd,bde->bne", x_bh, per_head_w(wk_ref),
                    preferred_element_type=F32) + per_head_b(bk_ref)
    vh = jnp.einsum("bnd,bde->bne", x_bh, per_head_w(wv_ref),
                    preferred_element_type=F32) + per_head_b(bv_ref)

    # ---- scores + softmax ----------------------------------------------------
    # bias = adjacency + distance + (1 - key_mask) * (-1e9), precombined in the
    # wrapper and kept strictly f32 (bf16 cannot represent -1e9 safely).
    bias = bias_ref[...]                                         # (B, N, N) f32
    bias_bh = jnp.broadcast_to(bias[:, None], (B, N_HEAD, N, N)).reshape(BH, N, N)

    scale = 1.0 / math.sqrt(HEAD_DIM)
    s = jnp.einsum("bqd,bkd->bqk", qh.astype(BF16), kh.astype(BF16),
                   preferred_element_type=F32) * scale + bias_bh  # (B*H, N, N) f32
    s = s - jnp.max(s, axis=-1, keepdims=True)
    p = jnp.exp(s)
    # EUP approx reciprocal instead of a VPU divide for the softmax denominator.
    p = p * pl.reciprocal(jnp.sum(p, axis=-1, keepdims=True), approx=True)

    # Single store of all heads' attention weights.
    attn_ref[...] = p.reshape(B, N_HEAD, N, N)

    # NOTE: only keys are masked (matches the PyTorch module); rows belonging to
    # padded query nodes are expected to be re-masked by downstream consumers.

    # ---- context + output projection ----------------------------------------
    ctx = jnp.einsum("bqk,bkd->bqd", p.astype(BF16), vh.astype(BF16),
                     preferred_element_type=F32)                  # (B*H, N, dh)

    # Per-head partial products with Wo, then a head-sum (no 8-lane concat).
    yh = jnp.einsum("bnd,bde->bne", ctx.astype(BF16), per_head_w(wo_ref),
                    preferred_element_type=F32)                   # (B*H, N, D)
    yh_r = yh.reshape(B, N_HEAD, N, D_MODEL)
    y = yh_r[:, 0]
    for h in range(1, N_HEAD):          # tiny static unroll: H-1 VPU adds
        y = y + yh_r[:, h]
    y = y + bo_ref[...]                                           # (B, N, D) f32

    # ---- AddNorm01 (pre_ln=True; dropout == identity in eval) ---------------
    x1 = x + _layer_norm(y, g1_ref[...], be1_ref[...])            # (B, N, D) f32

    # ---- PositionWiseFFN (batched over B; bf16 MXU, f32 vector math) --------
    w1 = jnp.broadcast_to(w1_ref[...][None], (B, D_MODEL, D_FFN))
    w2 = jnp.broadcast_to(w2_ref[...][None], (B, D_FFN, D_MODEL))
    h1 = _gelu(jnp.einsum("bnd,bdf->bnf", x1.astype(BF16), w1,
                          preferred_element_type=F32) + b1_ref[...])
    y2 = jnp.einsum("bnf,bfd->bnd", h1.astype(BF16), w2,
                    preferred_element_type=F32) + b2_ref[...]

    # ---- AddNorm02, single store ---------------------------------------------
    out_ref[...] = x1 + _layer_norm(y2, g2_ref[...], be2_ref[...])


def gtmgc_block(X, M3, A, Dmat, params):
    """Wrapper: one-time weight re-layout + single whole-batch pallas_call."""
    # Head-major weight views (done once in plain JAX; contiguous head chunks,
    # same convention as the PyTorch module / reference).
    def heads_in(w):                    # (D, D) -> (H, D, dh)
        return w.reshape(D_MODEL, N_HEAD, HEAD_DIM).transpose(1, 0, 2)

    wq_h = heads_in(params["wq"]).astype(BF16)
    wk_h = heads_in(params["wk"]).astype(BF16)
    wv_h = heads_in(params["wv"]).astype(BF16)
    bq_h = params["bq"].reshape(N_HEAD, 1, HEAD_DIM).astype(F32)
    bk_h = params["bk"].reshape(N_HEAD, 1, HEAD_DIM).astype(F32)
    bv_h = params["bv"].reshape(N_HEAD, 1, HEAD_DIM).astype(F32)
    wo_h = params["wo"].reshape(N_HEAD, HEAD_DIM, D_MODEL).astype(BF16)
    w1 = params["w1"].astype(BF16)
    w2 = params["w2"].astype(BF16)

    # Precombine the additive attention bias: halves bias DMA and removes two
    # VPU adds per step.  Kept f32 because of the -1e9 key-mask term.
    bias = (A + Dmat + (1.0 - M3) * (-1e9)).astype(F32)

    args = (X.astype(F32), bias,
            wq_h, wk_h, wv_h, bq_h, bk_h, bv_h,
            wo_h, params["bo"], params["g1"], params["be1"],
            w1, params["b1"], w2, params["b2"], params["g2"], params["be2"])

    out, attn = pl.pallas_call(
        gtmgc_block_kernel,
        out_shape=(jax.ShapeDtypeStruct((B, N, D_MODEL), F32),
                   jax.ShapeDtypeStruct((B, N_HEAD, N, N), F32)),
        # No grid: everything (a few KB) fits VMEM; one invocation avoids all
        # per-grid-step pipeline overhead.  Whole-array default BlockSpecs.
        compiler_params=pltpu.CompilerParams(vmem_limit_bytes=32 * 1024 * 1024),
    )(*args)
    return out, attn


def reference_forward(X, M3, A, Dmat, p):
    """Pure-JAX f32 reference of the same math, for a correctness check."""
    q = X @ p["wq"] + p["bq"]
    k = X @ p["wk"] + p["bk"]
    v = X @ p["wv"] + p["bv"]

    def split(t):  # (B, N, D) -> (B, H, N, dh), contiguous head chunks
        return t.reshape(B, N, N_HEAD, HEAD_DIM).transpose(0, 2, 1, 3)

    qh, kh, vh = split(q), split(k), split(v)
    s = jnp.einsum("bhqd,bhkd->bhqk", qh, kh) / math.sqrt(HEAD_DIM)
    bias = A + Dmat + (1.0 - M3) * (-1e9)            # (B, N, N)
    s = s + bias[:, None]
    s = s - s.max(-1, keepdims=True)
    pw = jnp.exp(s)
    pw = pw / pw.sum(-1, keepdims=True)
    ctx = jnp.einsum("bhqk,bhkd->bhqd", pw, vh).transpose(0, 2, 1, 3).reshape(B, N, D_MODEL)
    y = ctx @ p["wo"] + p["bo"]
    x1 = X + _layer_norm(y, p["g1"], p["be1"])
    h1 = _gelu(x1 @ p["w1"] + p["b1"])
    y2 = h1 @ p["w2"] + p["b2"]
    x2 = x1 + _layer_norm(y2, p["g2"], p["be2"])
    return x2, pw


def make_params(key):
    ks = jax.random.split(key, 8)

    def dense(k, din, dout, scale=0.05):
        return jax.random.normal(k, (din, dout), jnp.float32) * scale

    return {
        "wq": dense(ks[0], D_MODEL, D_MODEL), "bq": jnp.zeros((1, D_MODEL), jnp.float32),
        "wk": dense(ks[1], D_MODEL, D_MODEL), "bk": jnp.zeros((1, D_MODEL), jnp.float32),
        "wv": dense(ks[2], D_MODEL, D_MODEL), "bv": jnp.zeros((1, D_MODEL), jnp.float32),
        "wo": dense(ks[3], D_MODEL, D_MODEL), "bo": jnp.zeros((1, D_MODEL), jnp.float32),
        "g1": jnp.ones((1, D_MODEL), jnp.float32), "be1": jnp.zeros((1, D_MODEL), jnp.float32),
        "w1": dense(ks[4], D_MODEL, D_FFN), "b1": jnp.zeros((1, D_FFN), jnp.float32),
        "w2": dense(ks[5], D_FFN, D_MODEL), "b2": jnp.zeros((1, D_MODEL), jnp.float32),
        "g2": jnp.ones((1, D_MODEL), jnp.float32), "be2": jnp.zeros((1, D_MODEL), jnp.float32),
    }


if __name__ == "__main__":
    root = jax.random.PRNGKey(0)
    kp, kx, ka, kd = jax.random.split(root, 4)

    params = make_params(kp)

    # node_embedding, node_mask, adjacency, distance
    X = jax.random.normal(kx, (B, N, D_MODEL), jnp.float32)
    A = (jax.random.uniform(ka, (B, N, N)) < 0.3).astype(jnp.float32)
    A = jnp.maximum(A, A.transpose(0, 2, 1))                        # symmetric adjacency
    Dm = jax.random.uniform(kd, (B, N, N), minval=0.5, maxval=5.0)
    Dm = 0.5 * (Dm + Dm.transpose(0, 2, 1))                         # symmetric distances
    M = jnp.ones((B, N), jnp.float32).at[1, 6:].set(0.0)            # pad last 2 nodes of mol 1
    M3 = M[:, None, :]                                              # (B, 1, N)

    out, attn_w = gtmgc_block(X, M3, A, Dm, params)
    out = jax.block_until_ready(out)
    attn_w = jax.block_until_ready(attn_w)

    ref_out, ref_attn = reference_forward(X, M3, A, Dm, params)

    assert out.shape == (B, N, D_MODEL) and attn_w.shape == (B, N_HEAD, N, N)
    assert bool(jnp.all(jnp.isfinite(out))) and bool(jnp.all(jnp.isfinite(attn_w)))
    # Kernel uses bf16 MXU inputs (f32 accumulation) per TPU perf guidance, so it
    # is compared against the f32 reference at a bf16-appropriate tolerance.
    assert jnp.allclose(attn_w, ref_attn, atol=5e-2, rtol=5e-2)
    assert jnp.allclose(out, ref_out, atol=1e-1, rtol=1e-1)

    print("KERNEL_OK")
</pallas_src>

<mosaic_0001>
module attributes {stable_mosaic.version = 11 : i64} {
  func.func @gtmgc_block_kernel(%arg0: memref<2x8x32xf32, #tpu.memory_space<vmem>>, %arg1: memref<2x8x8xf32, #tpu.memory_space<vmem>>, %arg2: memref<4x32x8xbf16, #tpu.memory_space<vmem>>, %arg3: memref<4x32x8xbf16, #tpu.memory_space<vmem>>, %arg4: memref<4x32x8xbf16, #tpu.memory_space<vmem>>, %arg5: memref<4x1x8xf32, #tpu.memory_space<vmem>>, %arg6: memref<4x1x8xf32, #tpu.memory_space<vmem>>, %arg7: memref<4x1x8xf32, #tpu.memory_space<vmem>>, %arg8: memref<4x8x32xbf16, #tpu.memory_space<vmem>>, %arg9: memref<1x32xf32, #tpu.memory_space<vmem>>, %arg10: memref<1x32xf32, #tpu.memory_space<vmem>>, %arg11: memref<1x32xf32, #tpu.memory_space<vmem>>, %arg12: memref<32x64xbf16, #tpu.memory_space<vmem>>, %arg13: memref<1x64xf32, #tpu.memory_space<vmem>>, %arg14: memref<64x32xbf16, #tpu.memory_space<vmem>>, %arg15: memref<1x32xf32, #tpu.memory_space<vmem>>, %arg16: memref<1x32xf32, #tpu.memory_space<vmem>>, %arg17: memref<1x32xf32, #tpu.memory_space<vmem>>, %arg18: memref<2x8x32xf32, #tpu.memory_space<vmem>>, %arg19: memref<2x4x8x8xf32, #tpu.memory_space<vmem>>) attributes {dimension_semantics = [], scalar_prefetch = 0 : i64, scratch_operands = 0 : i64, tpu.core_type = #tpu.core_type<tc>} {
    %c0 = arith.constant 0 : index
    %c0_0 = arith.constant 0 : index
    %c0_1 = arith.constant 0 : index
    %0 = vector.load %arg0[%c0, %c0_0, %c0_1] : memref<2x8x32xf32, #tpu.memory_space<vmem>>, vector<2x8x32xf32>
    %1 = arith.truncf %0 : vector<2x8x32xf32> to vector<2x8x32xbf16>
    %2 = vector.shape_cast %1 : vector<2x8x32xbf16> to vector<2x1x8x32xbf16>
    %3 = vector.shape_cast %2 : vector<2x1x8x32xbf16> to vector<2x1x8x32xbf16>
    %4 = vector.broadcast %3 : vector<2x1x8x32xbf16> to vector<2x4x8x32xbf16>
    %5 = vector.shape_cast %4 : vector<2x4x8x32xbf16> to vector<8x8x32xbf16>
    %c0_2 = arith.constant 0 : index
    %c0_3 = arith.constant 0 : index
    %c0_4 = arith.constant 0 : index
    %6 = vector.load %arg2[%c0_2, %c0_3, %c0_4] : memref<4x32x8xbf16, #tpu.memory_space<vmem>>, vector<4x32x8xbf16>
    %7 = vector.shape_cast %6 : vector<4x32x8xbf16> to vector<1x4x32x8xbf16>
    %8 = vector.shape_cast %7 : vector<1x4x32x8xbf16> to vector<1x4x32x8xbf16>
    %9 = vector.broadcast %8 : vector<1x4x32x8xbf16> to vector<2x4x32x8xbf16>
    %10 = vector.shape_cast %9 : vector<2x4x32x8xbf16> to vector<8x32x8xbf16>
    "tpu.trace_start"() <{level = 10 : i32, message = "bnd,bde->bne"}> : () -> ()
    %cst = arith.constant dense<0.000000e+00> : vector<8x8x8xf32>
    %11 = tpu.matmul %5, %10, %cst {dimension_numbers = #tpu.dot_dimension_numbers<[2], [1], [1], [2], [0, 0, 0, 1, 1, 2], [0], [0]>} : vector<8x8x32xbf16>, vector<8x32x8xbf16>, vector<8x8x8xf32> -> vector<8x8x8xf32>
    "tpu.trace_stop"() : () -> ()
    %c0_5 = arith.constant 0 : index
    %c0_6 = arith.constant 0 : index
    %c0_7 = arith.constant 0 : index
    %12 = vector.load %arg5[%c0_5, %c0_6, %c0_7] : memref<4x1x8xf32, #tpu.memory_space<vmem>>, vector<4x1x8xf32>
    %13 = vector.shape_cast %12 : vector<4x1x8xf32> to vector<1x4x1x8xf32>
    %14 = vector.shape_cast %13 : vector<1x4x1x8xf32> to vector<1x4x1x8xf32>
    %15 = vector.broadcast %14 : vector<1x4x1x8xf32> to vector<2x4x1x8xf32>
    %16 = vector.shape_cast %15 : vector<2x4x1x8xf32> to vector<8x1x8xf32>
    %17 = vector.broadcast %16 : vector<8x1x8xf32> to vector<8x8x8xf32>
    %18 = arith.addf %11, %17 : vector<8x8x8xf32>
    %c0_8 = arith.constant 0 : index
    %c0_9 = arith.constant 0 : index
    %c0_10 = arith.constant 0 : index
    %19 = vector.load %arg3[%c0_8, %c0_9, %c0_10] : memref<4x32x8xbf16, #tpu.memory_space<vmem>>, vector<4x32x8xbf16>
    %20 = vector.shape_cast %19 : vector<4x32x8xbf16> to vector<1x4x32x8xbf16>
    %21 = vector.shape_cast %20 : vector<1x4x32x8xbf16> to vector<1x4x32x8xbf16>
    %22 = vector.broadcast %21 : vector<1x4x32x8xbf16> to vector<2x4x32x8xbf16>
    %23 = vector.shape_cast %22 : vector<2x4x32x8xbf16> to vector<8x32x8xbf16>
    "tpu.trace_start"() <{level = 10 : i32, message = "bnd,bde->bne"}> : () -> ()
    %cst_11 = arith.constant dense<0.000000e+00> : vector<8x8x8xf32>
    %24 = tpu.matmul %5, %23, %cst_11 {dimension_numbers = #tpu.dot_dimension_numbers<[2], [1], [1], [2], [0, 0, 0, 1, 1, 2], [0], [0]>} : vector<8x8x32xbf16>, vector<8x32x8xbf16>, vector<8x8x8xf32> -> vector<8x8x8xf32>
    "tpu.trace_stop"() : () -> ()
    %c0_12 = arith.constant 0 : index
    %c0_13 = arith.constant 0 : index
    %c0_14 = arith.constant 0 : index
    %25 = vector.load %arg6[%c0_12, %c0_13, %c0_14] : memref<4x1x8xf32, #tpu.memory_space<vmem>>, vector<4x1x8xf32>
    %26 = vector.shape_cast %25 : vector<4x1x8xf32> to vector<1x4x1x8xf32>
    %27 = vector.shape_cast %26 : vector<1x4x1x8xf32> to vector<1x4x1x8xf32>
    %28 = vector.broadcast %27 : vector<1x4x1x8xf32> to vector<2x4x1x8xf32>
    %29 = vector.shape_cast %28 : vector<2x4x1x8xf32> to vector<8x1x8xf32>
    %30 = vector.broadcast %29 : vector<8x1x8xf32> to vector<8x8x8xf32>
    %31 = arith.addf %24, %30 : vector<8x8x8xf32>
    %c0_15 = arith.constant 0 : index
    %c0_16 = arith.constant 0 : index
    %c0_17 = arith.constant 0 : index
    %32 = vector.load %arg4[%c0_15, %c0_16, %c0_17] : memref<4x32x8xbf16, #tpu.memory_space<vmem>>, vector<4x32x8xbf16>
    %33 = vector.shape_cast %32 : vector<4x32x8xbf16> to vector<1x4x32x8xbf16>
    %34 = vector.shape_cast %33 : vector<1x4x32x8xbf16> to vector<1x4x32x8xbf16>
    %35 = vector.broadcast %34 : vector<1x4x32x8xbf16> to vector<2x4x32x8xbf16>
    %36 = vector.shape_cast %35 : vector<2x4x32x8xbf16> to vector<8x32x8xbf16>
    "tpu.trace_start"() <{level = 10 : i32, message = "bnd,bde->bne"}> : () -> ()
    %cst_18 = arith.constant dense<0.000000e+00> : vector<8x8x8xf32>
    %37 = tpu.matmul %5, %36, %cst_18 {dimension_numbers = #tpu.dot_dimension_numbers<[2], [1], [1], [2], [0, 0, 0, 1, 1, 2], [0], [0]>} : vector<8x8x32xbf16>, vector<8x32x8xbf16>, vector<8x8x8xf32> -> vector<8x8x8xf32>
    "tpu.trace_stop"() : () -> ()
    %c0_19 = arith.constant 0 : index
    %c0_20 = arith.constant 0 : index
    %c0_21 = arith.constant 0 : index
    %38 = vector.load %arg7[%c0_19, %c0_20, %c0_21] : memref<4x1x8xf32, #tpu.memory_space<vmem>>, vector<4x1x8xf32>
    %39 = vector.shape_cast %38 : vector<4x1x8xf32> to vector<1x4x1x8xf32>
    %40 = vector.shape_cast %39 : vector<1x4x1x8xf32> to vector<1x4x1x8xf32>
    %41 = vector.broadcast %40 : vector<1x4x1x8xf32> to vector<2x4x1x8xf32>
    %42 = vector.shape_cast %41 : vector<2x4x1x8xf32> to vector<8x1x8xf32>
    %43 = vector.broadcast %42 : vector<8x1x8xf32> to vector<8x8x8xf32>
    %44 = arith.addf %37, %43 : vector<8x8x8xf32>
    %c0_22 = arith.constant 0 : index
    %c0_23 = arith.constant 0 : index
    %c0_24 = arith.constant 0 : index
    %45 = vector.load %arg1[%c0_22, %c0_23, %c0_24] : memref<2x8x8xf32, #tpu.memory_space<vmem>>, vector<2x8x8xf32>
    %46 = vector.shape_cast %45 : vector<2x8x8xf32> to vector<2x1x8x8xf32>
    %47 = vector.shape_cast %46 : vector<2x1x8x8xf32> to vector<2x1x8x8xf32>
    %48 = vector.broadcast %47 : vector<2x1x8x8xf32> to vector<2x4x8x8xf32>
    %49 = vector.shape_cast %48 : vector<2x4x8x8xf32> to vector<8x8x8xf32>
    %50 = arith.truncf %18 : vector<8x8x8xf32> to vector<8x8x8xbf16>
    %51 = arith.truncf %31 : vector<8x8x8xf32> to vector<8x8x8xbf16>
    "tpu.trace_start"() <{level = 10 : i32, message = "bqd,bkd->bqk"}> : () -> ()
    %cst_25 = arith.constant dense<0.000000e+00> : vector<8x8x8xf32>
    %52 = tpu.matmul %50, %51, %cst_25 {dimension_numbers = #tpu.dot_dimension_numbers<[2], [2], [1], [1], [0, 0, 0, 1, 1, 1], [0], [0]>} : vector<8x8x8xbf16>, vector<8x8x8xbf16>, vector<8x8x8xf32> -> vector<8x8x8xf32>
    "tpu.trace_stop"() : () -> ()
    %cst_26 = arith.constant 0.353553385 : f32
    %53 = vector.broadcast %cst_26 : f32 to vector<8x8x8xf32>
    %54 = arith.mulf %52, %53 : vector<8x8x8xf32>
    %55 = arith.addf %54, %49 : vector<8x8x8xf32>
    %cst_27 = arith.constant dense<0xFF800000> : vector<8x8xf32>
    %56 = vector.multi_reduction <maximumf>, %55, %cst_27 [2] : vector<8x8x8xf32> to vector<8x8xf32>
    %57 = vector.shape_cast %56 : vector<8x8xf32> to vector<8x8x1xf32>
    %58 = vector.broadcast %57 : vector<8x8x1xf32> to vector<8x8x8xf32>
    %59 = arith.subf %55, %58 : vector<8x8x8xf32>
    %60 = math.exp %59 : vector<8x8x8xf32>
    %cst_28 = arith.constant dense<0.000000e+00> : vector<8x8xf32>
    %61 = vector.multi_reduction <add>, %60, %cst_28 [2] : vector<8x8x8xf32> to vector<8x8xf32>
    %62 = vector.shape_cast %61 : vector<8x8xf32> to vector<8x8x1xf32>
    %63 = tpu.reciprocal %62 {approx = true} : vector<8x8x1xf32> -> vector<8x8x1xf32>
    %64 = vector.broadcast %63 : vector<8x8x1xf32> to vector<8x8x8xf32>
    %65 = arith.mulf %60, %64 : vector<8x8x8xf32>
    %66 = vector.shape_cast %65 : vector<8x8x8xf32> to vector<2x4x8x8xf32>
    %c0_29 = arith.constant 0 : index
    %c0_30 = arith.constant 0 : index
    %c0_31 = arith.constant 0 : index
    %c0_32 = arith.constant 0 : index
    %67 = vector.load %arg19[%c0_29, %c0_30, %c0_31, %c0_32] : memref<2x4x8x8xf32, #tpu.memory_space<vmem>>, vector<2x4x8x8xf32>
    tpu.vector_store %arg19[%c0_29, %c0_30, %c0_31, %c0_32], %66 {strides = array<i32>} : memref<2x4x8x8xf32, #tpu.memory_space<vmem>>, vector<2x4x8x8xf32>,
    %68 = arith.truncf %65 : vector<8x8x8xf32> to vector<8x8x8xbf16>
    %69 = arith.truncf %44 : vector<8x8x8xf32> to vector<8x8x8xbf16>
    "tpu.trace_start"() <{level = 10 : i32, message = "bqk,bkd->bqd"}> : () -> ()
    %cst_33 = arith.constant dense<0.000000e+00> : vector<8x8x8xf32>
    %70 = tpu.matmul %68, %69, %cst_33 {dimension_numbers = #tpu.dot_dimension_numbers<[2], [1], [1], [2], [0, 0, 0, 1, 1, 2], [0], [0]>} : vector<8x8x8xbf16>, vector<8x8x8xbf16>, vector<8x8x8xf32> -> vector<8x8x8xf32>
    "tpu.trace_stop"() : () -> ()
    %71 = arith.truncf %70 : vector<8x8x8xf32> to vector<8x8x8xbf16>
    %c0_34 = arith.constant 0 : index
    %c0_35 = arith.constant 0 : index
    %c0_36 = arith.constant 0 : index
    %72 = vector.load %arg8[%c0_34, %c0_35, %c0_36] : memref<4x8x32xbf16, #tpu.memory_space<vmem>>, vector<4x8x32xbf16>
    %73 = vector.shape_cast %72 : vector<4x8x32xbf16> to vector<1x4x8x32xbf16>
    %74 = vector.shape_cast %73 : vector<1x4x8x32xbf16> to vector<1x4x8x32xbf16>
    %75 = vector.broadcast %74 : vector<1x4x8x32xbf16> to vector<2x4x8x32xbf16>
    %76 = vector.shape_cast %75 : vector<2x4x8x32xbf16> to vector<8x8x32xbf16>
    "tpu.trace_start"() <{level = 10 : i32, message = "bnd,bde->bne"}> : () -> ()
    %cst_37 = arith.constant dense<0.000000e+00> : vector<8x8x32xf32>
    %77 = tpu.matmul %71, %76, %cst_37 {dimension_numbers = #tpu.dot_dimension_numbers<[2], [1], [1], [2], [0, 0, 0, 1, 1, 2], [0], [0]>} : vector<8x8x8xbf16>, vector<8x8x32xbf16>, vector<8x8x32xf32> -> vector<8x8x32xf32>
    "tpu.trace_stop"() : () -> ()
    %78 = vector.shape_cast %77 : vector<8x8x32xf32> to vector<2x4x8x32xf32>
    %79 = vector.extract_strided_slice %78 {offsets = [0, 0, 0, 0], sizes = [2, 1, 8, 32], strides = [1, 1, 1, 1]} : vector<2x4x8x32xf32> to vector<2x1x8x32xf32>
    %80 = vector.shape_cast %79 : vector<2x1x8x32xf32> to vector<2x8x32xf32>
    %81 = vector.extract_strided_slice %78 {offsets = [0, 1, 0, 0], sizes = [2, 1, 8, 32], strides = [1, 1, 1, 1]} : vector<2x4x8x32xf32> to vector<2x1x8x32xf32>
    %82 = vector.shape_cast %81 : vector<2x1x8x32xf32> to vector<2x8x32xf32>
    %83 = arith.addf %80, %82 : vector<2x8x32xf32>
    %84 = vector.extract_strided_slice %78 {offsets = [0, 2, 0, 0], sizes = [2, 1, 8, 32], strides = [1, 1, 1, 1]} : vector<2x4x8x32xf32> to vector<2x1x8x32xf32>
    %85 = vector.shape_cast %84 : vector<2x1x8x32xf32> to vector<2x8x32xf32>
    %86 = arith.addf %83, %85 : vector<2x8x32xf32>
    %87 = vector.extract_strided_slice %78 {offsets = [0, 3, 0, 0], sizes = [2, 1, 8, 32], strides = [1, 1, 1, 1]} : vector<2x4x8x32xf32> to vector<2x1x8x32xf32>
    %88 = vector.shape_cast %87 : vector<2x1x8x32xf32> to vector<2x8x32xf32>
    %89 = arith.addf %86, %88 : vector<2x8x32xf32>
    %c0_38 = arith.constant 0 : index
    %c0_39 = arith.constant 0 : index
    %90 = vector.load %arg9[%c0_38, %c0_39] : memref<1x32xf32, #tpu.memory_space<vmem>>, vector<1x32xf32>
    %91 = vector.shape_cast %90 : vector<1x32xf32> to vector<1x1x32xf32>
    %92 = vector.broadcast %91 : vector<1x1x32xf32> to vector<2x8x32xf32>
    %93 = arith.addf %89, %92 : vector<2x8x32xf32>
    %c0_40 = arith.constant 0 : index
    %c0_41 = arith.constant 0 : index
    %94 = vector.load %arg10[%c0_40, %c0_41] : memref<1x32xf32, #tpu.memory_space<vmem>>, vector<1x32xf32>
    %c0_42 = arith.constant 0 : index
    %c0_43 = arith.constant 0 : index
    %95 = vector.load %arg11[%c0_42, %c0_43] : memref<1x32xf32, #tpu.memory_space<vmem>>, vector<1x32xf32>
    %cst_44 = arith.constant dense<0.000000e+00> : vector<2x8xf32>
    %96 = vector.multi_reduction <add>, %93, %cst_44 [2] : vector<2x8x32xf32> to vector<2x8xf32>
    %97 = vector.shape_cast %96 : vector<2x8xf32> to vector<2x8x1xf32>
    %cst_45 = arith.constant 3.200000e+01 : f32
    %98 = vector.broadcast %cst_45 : f32 to vector<2x8x1xf32>
    %99 = arith.divf %97, %98 : vector<2x8x1xf32>
    %100 = vector.broadcast %99 : vector<2x8x1xf32> to vector<2x8x32xf32>
    %101 = arith.subf %93, %100 : vector<2x8x32xf32>
    %102 = arith.mulf %101, %101 : vector<2x8x32xf32>
    %cst_46 = arith.constant dense<0.000000e+00> : vector<2x8xf32>
    %103 = vector.multi_reduction <add>, %102, %cst_46 [2] : vector<2x8x32xf32> to vector<2x8xf32>
    %104 = vector.shape_cast %103 : vector<2x8xf32> to vector<2x8x1xf32>
    %cst_47 = arith.constant 3.200000e+01 : f32
    %105 = vector.broadcast %cst_47 : f32 to vector<2x8x1xf32>
    %106 = arith.divf %104, %105 : vector<2x8x1xf32>
    %107 = vector.broadcast %99 : vector<2x8x1xf32> to vector<2x8x32xf32>
    %108 = arith.subf %93, %107 : vector<2x8x32xf32>
    %cst_48 = arith.constant 9.99999974E-6 : f32
    %109 = vector.broadcast %cst_48 : f32 to vector<2x8x1xf32>
    %110 = arith.addf %106, %109 : vector<2x8x1xf32>
    %111 = math.rsqrt %110 : vector<2x8x1xf32>
    %112 = vector.broadcast %111 : vector<2x8x1xf32> to vector<2x8x32xf32>
    %113 = arith.mulf %108, %112 : vector<2x8x32xf32>
    %114 = vector.shape_cast %94 : vector<1x32xf32> to vector<1x1x32xf32>
    %115 = vector.broadcast %114 : vector<1x1x32xf32> to vector<2x8x32xf32>
    %116 = arith.mulf %113, %115 : vector<2x8x32xf32>
    %117 = vector.shape_cast %95 : vector<1x32xf32> to vector<1x1x32xf32>
    %118 = vector.broadcast %117 : vector<1x1x32xf32> to vector<2x8x32xf32>
    %119 = arith.addf %116, %118 : vector<2x8x32xf32>
    %120 = arith.addf %0, %119 : vector<2x8x32xf32>
    %c0_49 = arith.constant 0 : index
    %c0_50 = arith.constant 0 : index
    %121 = vector.load %arg12[%c0_49, %c0_50] : memref<32x64xbf16, #tpu.memory_space<vmem>>, vector<32x64xbf16>
    %122 = vector.shape_cast %121 : vector<32x64xbf16> to vector<1x32x64xbf16>
    %123 = vector.shape_cast %122 : vector<1x32x64xbf16> to vector<1x32x64xbf16>
    %124 = vector.broadcast %123 : vector<1x32x64xbf16> to vector<2x32x64xbf16>
    %c0_51 = arith.constant 0 : index
    %c0_52 = arith.constant 0 : index
    %125 = vector.load %arg14[%c0_51, %c0_52] : memref<64x32xbf16, #tpu.memory_space<vmem>>, vector<64x32xbf16>
    %126 = vector.shape_cast %125 : vector<64x32xbf16> to vector<1x64x32xbf16>
    %127 = vector.shape_cast %126 : vector<1x64x32xbf16> to vector<1x64x32xbf16>
    %128 = vector.broadcast %127 : vector<1x64x32xbf16> to vector<2x64x32xbf16>
    %129 = arith.truncf %120 : vector<2x8x32xf32> to vector<2x8x32xbf16>
    "tpu.trace_start"() <{level = 10 : i32, message = "bnd,bdf->bnf"}> : () -> ()
    %cst_53 = arith.constant dense<0.000000e+00> : vector<2x8x64xf32>
    %130 = tpu.matmul %129, %124, %cst_53 {dimension_numbers = #tpu.dot_dimension_numbers<[2], [1], [1], [2], [0, 0, 0, 1, 1, 2], [0], [0]>} : vector<2x8x32xbf16>, vector<2x32x64xbf16>, vector<2x8x64xf32> -> vector<2x8x64xf32>
    "tpu.trace_stop"() : () -> ()
    %c0_54 = arith.constant 0 : index
    %c0_55 = arith.constant 0 : index
    %131 = vector.load %arg13[%c0_54, %c0_55] : memref<1x64xf32, #tpu.memory_space<vmem>>, vector<1x64xf32>
    %132 = vector.shape_cast %131 : vector<1x64xf32> to vector<1x1x64xf32>
    %133 = vector.broadcast %132 : vector<1x1x64xf32> to vector<2x8x64xf32>
    %134 = arith.addf %130, %133 : vector<2x8x64xf32>
    %cst_56 = arith.constant 5.000000e-01 : f32
    %135 = vector.broadcast %cst_56 : f32 to vector<2x8x64xf32>
    %136 = arith.mulf %135, %134 : vector<2x8x64xf32>
    %cst_57 = arith.constant 4.471500e-02 : f32
    %137 = vector.broadcast %cst_57 : f32 to vector<2x8x64xf32>
    %138 = arith.mulf %137, %134 : vector<2x8x64xf32>
    %139 = arith.mulf %138, %134 : vector<2x8x64xf32>
    %140 = arith.mulf %139, %134 : vector<2x8x64xf32>
    %141 = arith.addf %134, %140 : vector<2x8x64xf32>
    %cst_58 = arith.constant 0.797884583 : f32
    %142 = vector.broadcast %cst_58 : f32 to vector<2x8x64xf32>
    %143 = arith.mulf %142, %141 : vector<2x8x64xf32>
    %144 = math.tanh %143 : vector<2x8x64xf32>
    %cst_59 = arith.constant 1.000000e+00 : f32
    %145 = vector.broadcast %cst_59 : f32 to vector<2x8x64xf32>
    %146 = arith.addf %145, %144 : vector<2x8x64xf32>
    %147 = arith.mulf %136, %146 : vector<2x8x64xf32>
    %148 = arith.truncf %147 : vector<2x8x64xf32> to vector<2x8x64xbf16>
    "tpu.trace_start"() <{level = 10 : i32, message = "bnf,bfd->bnd"}> : () -> ()
    %cst_60 = arith.constant dense<0.000000e+00> : vector<2x8x32xf32>
    %149 = tpu.matmul %148, %128, %cst_60 {dimension_numbers = #tpu.dot_dimension_numbers<[2], [1], [1], [2], [0, 0, 0, 1, 1, 2], [0], [0]>} : vector<2x8x64xbf16>, vector<2x64x32xbf16>, vector<2x8x32xf32> -> vector<2x8x32xf32>
    "tpu.trace_stop"() : () -> ()
    %c0_61 = arith.constant 0 : index
    %c0_62 = arith.constant 0 : index
    %150 = vector.load %arg15[%c0_61, %c0_62] : memref<1x32xf32, #tpu.memory_space<vmem>>, vector<1x32xf32>
    %151 = vector.shape_cast %150 : vector<1x32xf32> to vector<1x1x32xf32>
    %152 = vector.broadcast %151 : vector<1x1x32xf32> to vector<2x8x32xf32>
    %153 = arith.addf %149, %152 : vector<2x8x32xf32>
    %c0_63 = arith.constant 0 : index
    %c0_64 = arith.constant 0 : index
    %154 = vector.load %arg16[%c0_63, %c0_64] : memref<1x32xf32, #tpu.memory_space<vmem>>, vector<1x32xf32>
    %c0_65 = arith.constant 0 : index
    %c0_66 = arith.constant 0 : index
    %155 = vector.load %arg17[%c0_65, %c0_66] : memref<1x32xf32, #tpu.memory_space<vmem>>, vector<1x32xf32>
    %cst_67 = arith.constant dense<0.000000e+00> : vector<2x8xf32>
    %156 = vector.multi_reduction <add>, %153, %cst_67 [2] : vector<2x8x32xf32> to vector<2x8xf32>
    %157 = vector.shape_cast %156 : vector<2x8xf32> to vector<2x8x1xf32>
    %cst_68 = arith.constant 3.200000e+01 : f32
    %158 = vector.broadcast %cst_68 : f32 to vector<2x8x1xf32>
    %159 = arith.divf %157, %158 : vector<2x8x1xf32>
    %160 = vector.broadcast %159 : vector<2x8x1xf32> to vector<2x8x32xf32>
    %161 = arith.subf %153, %160 : vector<2x8x32xf32>
    %162 = arith.mulf %161, %161 : vector<2x8x32xf32>
    %cst_69 = arith.constant dense<0.000000e+00> : vector<2x8xf32>
    %163 = vector.multi_reduction <add>, %162, %cst_69 [2] : vector<2x8x32xf32> to vector<2x8xf32>
    %164 = vector.shape_cast %163 : vector<2x8xf32> to vector<2x8x1xf32>
    %cst_70 = arith.constant 3.200000e+01 : f32
    %165 = vector.broadcast %cst_70 : f32 to vector<2x8x1xf32>
    %166 = arith.divf %164, %165 : vector<2x8x1xf32>
    %167 = vector.broadcast %159 : vector<2x8x1xf32> to vector<2x8x32xf32>
    %168 = arith.subf %153, %167 : vector<2x8x32xf32>
    %cst_71 = arith.constant 9.99999974E-6 : f32
    %169 = vector.broadcast %cst_71 : f32 to vector<2x8x1xf32>
    %170 = arith.addf %166, %169 : vector<2x8x1xf32>
    %171 = math.rsqrt %170 : vector<2x8x1xf32>
    %172 = vector.broadcast %171 : vector<2x8x1xf32> to vector<2x8x32xf32>
    %173 = arith.mulf %168, %172 : vector<2x8x32xf32>
    %174 = vector.shape_cast %154 : vector<1x32xf32> to vector<1x1x32xf32>
    %175 = vector.broadcast %174 : vector<1x1x32xf32> to vector<2x8x32xf32>
    %176 = arith.mulf %173, %175 : vector<2x8x32xf32>
    %177 = vector.shape_cast %155 : vector<1x32xf32> to vector<1x1x32xf32>
    %178 = vector.broadcast %177 : vector<1x1x32xf32> to vector<2x8x32xf32>
    %179 = arith.addf %176, %178 : vector<2x8x32xf32>
    %180 = arith.addf %120, %179 : vector<2x8x32xf32>
    %c0_72 = arith.constant 0 : index
    %c0_73 = arith.constant 0 : index
    %c0_74 = arith.constant 0 : index
    %181 = vector.load %arg18[%c0_72, %c0_73, %c0_74] : memref<2x8x32xf32, #tpu.memory_space<vmem>>, vector<2x8x32xf32>
    tpu.vector_store %arg18[%c0_72, %c0_73, %c0_74], %180 {strides = array<i32>} : memref<2x8x32xf32, #tpu.memory_space<vmem>>, vector<2x8x32xf32>,
    return
  }
}

</mosaic_0001>

<bundles_post_ra>
// kernel: tpu_custom_call.1
= control target key start
LH: loop header
LB: loop body
LE: loop exit
PB: predicated region body
PF: predicated region fallthrough
CT: control target
= control target key end

     0   :  { %s4400_s0 = inlined_call_operand.vmem [shape: f32[2,8,32], index: 0, kind: input, shape index: {}]   ;;  %s4401_s1 = inlined_call_operand.vmem [shape: f32[2,8,8], index: 1, kind: input, shape index: {}]   ;;  %s4402_s2 = inlined_call_operand.vmem [shape: bf16[4,32,8], index: 2, kind: input, shape index: {}]   ;;  %s4403_s3 = inlined_call_operand.vmem [shape: bf16[4,32,8], index: 3, kind: input, shape index: {}]   ;;  %s4404_s4 = inlined_call_operand.vmem [shape: bf16[4,32,8], index: 4, kind: input, shape index: {}]   ;;  %s4405_s5 = inlined_call_operand.vmem [shape: f32[4,1,8], index: 5, kind: input, shape index: {}]   ;;  %s4406_s6 = inlined_call_operand.vmem [shape: f32[4,1,8], index: 6, kind: input, shape index: {}]   ;;  %s4407_s7 = inlined_call_operand.vmem [shape: f32[4,1,8], index: 7, kind: input, shape index: {}]   ;;  %s4408_s8 = inlined_call_operand.vmem [shape: bf16[4,8,32], index: 8, kind: input, shape index: {}]   ;;  %s4409_s9 = inlined_call_operand.vmem [shape: f32[1,32], index: 9, kind: input, shape index: {}]   ;;  %s4410_s10 = inlined_call_operand.vmem [shape: f32[1,32], index: 10, kind: input, shape index: {}]   ;;  %s4411_s11 = inlined_call_operand.vmem [shape: f32[1,32], index: 11, kind: input, shape index: {}]   ;;  %s4412_s12 = inlined_call_operand.vmem [shape: bf16[32,64], index: 12, kind: input, shape index: {}]   ;;  %s4413_s13 = inlined_call_operand.vmem [shape: f32[1,64], index: 13, kind: input, shape index: {}]   ;;  %s4414_s14 = inlined_call_operand.vmem [shape: bf16[64,32], index: 14, kind: input, shape index: {}]   ;;  %s4415_s15 = inlined_call_operand.vmem [shape: f32[1,32], index: 15, kind: input, shape index: {}]   ;;  %s4416_s16 = inlined_call_operand.vmem [shape: f32[1,32], index: 16, kind: input, shape index: {}]   ;;  %s4417_s17 = inlined_call_operand.vmem [shape: f32[1,32], index: 17, kind: input, shape index: {}]   ;;  %s4418_s18 = inlined_call_operand.hbm [shape: f32[2,8,32], index: 18, kind: output, shape index: {0}]   ;;  %s4419_s19 = inlined_call_operand.hbm [shape: f32[2,4,8,8], index: 19, kind: output, shape index: {1}]  }
   0x1   :  { %4424 = sst [smem:[#allocation8_spill]] %s4400_s0 }
   0x2   :  { %4425 = sst [smem:[#allocation9_spill]] %s4401_s1 }
   0x3   :  { %4426 = sst [smem:[#allocation10_spill]] %s4402_s2 }
   0x4   :  { %4427 = sst [smem:[#allocation11_spill]] %s4403_s3 }
   0x5   :  { %25 = vsyncpa [#allocation3], 0  ;;  %s4428_s20 = sld [smem:[#allocation10_spill]]  ;;  %v3701_v1 = vmov 0.0   ;;  %vm3702_vm0 = vmmov 0   ;;  %vm124_vm1 = vcmask 261120  }
   0x6   :  { %3199 = vmatprep.subr.bf16.mxu0 %v3701_v1  ;;  %3207 = vmatprep.subr.bf16.mxu1 %v3701_v1  ;;  %s4429_s26 = sld [smem:[#allocation8_spill]] }
   0x7   :  { %3203 = vmatprep.mubr.msk.bf16.mxu0 %vm3702_vm0, %v3701_v1  ;;  %3211 = vmatprep.mubr.msk.bf16.mxu1 %vm3702_vm0, %v3701_v1 }
   0xb   :  { %v3581_v0 = vld [vmem:[%s4428_s20 + $0x8] sm:$0xff]   ;;  %v3582_v2 = vld [vmem:[%s4428_s20 + $0x18] sm:$0xff]   ;;  %v3583_v3 = vld [vmem:[%s4428_s20] sm:$0xff]  }
   0xc   :  { %3200 = vmatpush3.bf16.msra.mxu0 %v3581_v0  ;;  %3208 = vmatpush3.bf16.msra.mxu1 %v3582_v2  ;;  %v3584_v4 = vld [vmem:[%s4428_s20 + $0x10] sm:$0xff]   ;;  %v64_v5 = vld [vmem:[%s4429_s26] sm:$0xff]  ;;  %v3585_v7 = vld [vmem:[%s4428_s20 + $0x28] sm:$0xff]  }
   0xd   :  { %3201 = vmatprep.subr.bf16.mxu0 %v3701_v1  ;;  %3209 = vmatprep.subr.bf16.mxu1 %v3701_v1  ;;  %v3830_v6 = vpack.c.bf16 %v64_v5, %v64_v5  ;;  %v3586_v8 = vld [vmem:[%s4428_s20 + $0x38] sm:$0xff]   ;;  %v3587_v9 = vld [vmem:[%s4428_s20 + $0x20] sm:$0xff]   ;;  %v3588_v10 = vld [vmem:[%s4428_s20 + $0x30] sm:$0xff]  }
   0xe   :  { %v65_v11 = vld [vmem:[%s4429_s26 + $0x8] sm:$0xff] }
   0xf   :  { %v3871_v12 = vpack.c.bf16 %v65_v11, %v65_v11 }
  0x10   :  { %3202 = vmatpush3.bf16.msra.mxu0 %v3583_v3  ;;  %3210 = vmatpush3.bf16.msra.mxu1 %v3584_v4 }
  0x11   :  { %3215 = vmatprep.subr.bf16.mxu0 %v3701_v1  ;;  %3223 = vmatprep.subr.bf16.mxu1 %v3701_v1 }
  0x13   :  { %3204 = vmatmul.mubr.msk.bf16.vlgmr.msra.gmra.mxu0 %vm124_vm1, %v3830_v6  ;;  %3212 = vmatmul.mubr.msk.bf16.vlgmr.msra.gmra.mxu1 %vm124_vm1, %v3830_v6 }
  0x14   :  { %3216 = vmatpush3.bf16.msra.mxu0 %v3585_v7  ;;  %3224 = vmatpush3.bf16.msra.mxu1 %v3586_v8 }
  0x15   :  { %3217 = vmatprep.subr.bf16.mxu0 %v3701_v1  ;;  %3225 = vmatprep.subr.bf16.mxu1 %v3701_v1 }
  0x16   :  { %3219 = vmatprep.mubr.msk.bf16.mxu0 %vm3702_vm0, %v3701_v1  ;;  %3227 = vmatprep.mubr.msk.bf16.mxu1 %vm3702_vm0, %v3701_v1 }
  0x18   :  { %3218 = vmatpush3.bf16.msra.mxu0 %v3587_v9  ;;  %3226 = vmatpush3.bf16.msra.mxu1 %v3588_v10 }
  0x19   :  { %3231 = vmatprep.subr.bf16.mxu0 %v3701_v1  ;;  %3239 = vmatprep.subr.bf16.mxu1 %v3701_v1 }
  0x1b   :  { %3220 = vmatmul.mubr.msk.bf16.vlgmr.msra.gmra.mxu0 %vm124_vm1, %v3830_v6  ;;  %3228 = vmatmul.mubr.msk.bf16.vlgmr.msra.gmra.mxu1 %vm124_vm1, %v3830_v6 }
  0x1c   :  { %3232 = vmatpush3.bf16.msra.mxu0 %v3581_v0  ;;  %3240 = vmatpush3.bf16.msra.mxu1 %v3582_v2 }
  0x1d   :  { %3233 = vmatprep.subr.bf16.mxu0 %v3701_v1  ;;  %3241 = vmatprep.subr.bf16.mxu1 %v3701_v1 }
  0x1e   :  { %3235 = vmatprep.mubr.msk.bf16.mxu0 %vm3702_vm0, %v3701_v1  ;;  %3243 = vmatprep.mubr.msk.bf16.mxu1 %vm3702_vm0, %v3701_v1 }
  0x20   :  { %3234 = vmatpush3.bf16.msra.mxu0 %v3583_v3  ;;  %3242 = vmatpush3.bf16.msra.mxu1 %v3584_v4 }
  0x21   :  { %3247 = vmatprep.subr.bf16.mxu0 %v3701_v1  ;;  %3255 = vmatprep.subr.bf16.mxu1 %v3701_v1 }
  0x23   :  { %3236 = vmatmul.mubr.msk.bf16.vlgmr.msra.gmra.mxu0 %vm124_vm1, %v3871_v12  ;;  %3244 = vmatmul.mubr.msk.bf16.vlgmr.msra.gmra.mxu1 %vm124_vm1, %v3871_v12 }
  0x24   :  { %3248 = vmatpush3.bf16.msra.mxu0 %v3585_v7 }
  0x25   :  { %26 = vsyncpa [#allocation5], 0  ;;  %3256 = vmatpush3.bf16.msra.mxu1 %v3586_v8  ;;  %3249 = vmatprep.subr.bf16.mxu0 %v3701_v1  ;;  %s4430_s25 = sld [smem:[#allocation11_spill]]  ;;  %v3597_v21 = vld [vmem:[%s4404_s4 + $0x8] sm:$0xff]   ;;  %v3598_v22 = vld [vmem:[%s4404_s4] sm:$0xff]   ;;  %vm1329_vm2 = vcmask 64512  }
  0x26   :  { %3257 = vmatprep.subr.bf16.mxu1 %v3701_v1  ;;  %3251 = vmatprep.mubr.msk.bf16.mxu0 %vm3702_vm0, %v3701_v1  ;;  %v3599_v23 = vld [vmem:[%s4404_s4 + $0x18] sm:$0xff]   ;;  %v3600_v24 = vld [vmem:[%s4404_s4 + $0x10] sm:$0xff]   ;;  %v3601_v25 = vld [vmem:[%s4404_s4 + $0x28] sm:$0xff]   ;;  %vm1829_vm3 = vcmask 1043456   ;;  %s4431_s21 = sld [smem:[#allocation9_spill]]  ;;  %vm2795_vm4 = vcmask 523264  }
  0x27   :  { %3259 = vmatprep.mubr.msk.bf16.mxu1 %vm3702_vm0, %v3701_v1  ;;  %v3602_v26 = vld [vmem:[%s4404_s4 + $0x20] sm:$0xff]   ;;  %v3603_v27 = vld [vmem:[%s4404_s4 + $0x38] sm:$0xff]   ;;  %v3604_v28 = vld [vmem:[%s4404_s4 + $0x30] sm:$0xff]  }
  0x28   :  { %3250 = vmatpush3.bf16.msra.mxu0 %v3587_v9  ;;  %v2982_v60 = vld [vmem:[%s4406_s6] ss:$0 sm:$0xff]  ;;  %v2983_v62 = vld [vmem:[%s4406_s6 + $0x1] ss:$0 sm:$0xff] }
  0x29   :  { %3258 = vmatpush3.bf16.msra.mxu1 %v3588_v10  ;;  %3263 = vmatprep.subr.bf16.mxu0 %v3701_v1  ;;  %v4060_v7 = vld [vmem:[%s4405_s5] ss:$0 sm:$0xff]  ;;  %v4065_v10 = vld [vmem:[%s4405_s5 + $0x1] ss:$0 sm:$0xff] }
  0x2a   :  { %3271 = vmatprep.subr.bf16.mxu1 %v3701_v1 }
  0x2b   :  { %v3589_v13 = vld [vmem:[%s4430_s25 + $0x8] sm:$0xff]   ;;  %v3590_v14 = vld [vmem:[%s4430_s25 + $0x18] sm:$0xff]   ;;  %3252 = vmatmul.mubr.msk.bf16.vlgmr.msra.gmra.mxu0 %vm124_vm1, %v3871_v12  ;;  %v3591_v15 = vld [vmem:[%s4430_s25] sm:$0xff]  }
  0x2c   :  { %3260 = vmatmul.mubr.msk.bf16.vlgmr.msra.gmra.mxu1 %vm124_vm1, %v3871_v12  ;;  %3264 = vmatpush3.bf16.msra.mxu0 %v3589_v13  ;;  %v3592_v16 = vld [vmem:[%s4430_s25 + $0x10] sm:$0xff]   ;;  %v3593_v17 = vld [vmem:[%s4430_s25 + $0x28] sm:$0xff]   ;;  %v3594_v18 = vld [vmem:[%s4430_s25 + $0x38] sm:$0xff]  }
  0x2d   :  { %3272 = vmatpush3.bf16.msra.mxu1 %v3590_v14  ;;  %3265 = vmatprep.subr.bf16.mxu0 %v3701_v1  ;;  %v3595_v19 = vld [vmem:[%s4430_s25 + $0x20] sm:$0xff]   ;;  %v3596_v20 = vld [vmem:[%s4430_s25 + $0x30] sm:$0xff]  }
  0x2e   :  { %3273 = vmatprep.subr.bf16.mxu1 %v3701_v1  ;;  %3267 = vmatprep.mubr.msk.bf16.mxu0 %vm3702_vm0, %v3701_v1 }
  0x2f   :  { %3275 = vmatprep.mubr.msk.bf16.mxu1 %vm3702_vm0, %v3701_v1 }
  0x30   :  { %3266 = vmatpush3.bf16.msra.mxu0 %v3591_v15 }
  0x31   :  { %3274 = vmatpush3.bf16.msra.mxu1 %v3592_v16  ;;  %3279 = vmatprep.subr.bf16.mxu0 %v3701_v1 }
  0x32   :  { %3287 = vmatprep.subr.bf16.mxu1 %v3701_v1 }
  0x33   :  { %3268 = vmatmul.mubr.msk.bf16.vlgmr.msra.gmra.mxu0 %vm124_vm1, %v3830_v6 }
  0x34   :  { %3276 = vmatmul.mubr.msk.bf16.vlgmr.msra.gmra.mxu1 %vm124_vm1, %v3830_v6  ;;  %3280 = vmatpush3.bf16.msra.mxu0 %v3593_v17 }
  0x35   :  { %3288 = vmatpush3.bf16.msra.mxu1 %v3594_v18  ;;  %3281 = vmatprep.subr.bf16.mxu0 %v3701_v1 }
  0x36   :  { %3289 = vmatprep.subr.bf16.mxu1 %v3701_v1  ;;  %3283 = vmatprep.mubr.msk.bf16.mxu0 %vm3702_vm0, %v3701_v1 }
  0x37   :  { %3291 = vmatprep.mubr.msk.bf16.mxu1 %vm3702_vm0, %v3701_v1 }
  0x38   :  { %3282 = vmatpush3.bf16.msra.mxu0 %v3595_v19 }
  0x39   :  { %3290 = vmatpush3.bf16.msra.mxu1 %v3596_v20  ;;  %3295 = vmatprep.subr.bf16.mxu0 %v3701_v1 }
  0x3a   :  { %3303 = vmatprep.subr.bf16.mxu1 %v3701_v1 }
  0x3b   :  { %3284 = vmatmul.mubr.msk.bf16.vlgmr.msra.gmra.mxu0 %vm124_vm1, %v3830_v6 }
  0x3c   :  { %3292 = vmatmul.mubr.msk.bf16.vlgmr.msra.gmra.mxu1 %vm124_vm1, %v3830_v6  ;;  %3296 = vmatpush3.bf16.msra.mxu0 %v3589_v13 }
  0x3d   :  { %3304 = vmatpush3.bf16.msra.mxu1 %v3590_v14  ;;  %3297 = vmatprep.subr.bf16.mxu0 %v3701_v1 }
  0x3e   :  { %3305 = vmatprep.subr.bf16.mxu1 %v3701_v1  ;;  %3299 = vmatprep.mubr.msk.bf16.mxu0 %vm3702_vm0, %v3701_v1 }
  0x3f   :  { %3307 = vmatprep.mubr.msk.bf16.mxu1 %vm3702_vm0, %v3701_v1 }
  0x40   :  { %3298 = vmatpush3.bf16.msra.mxu0 %v3591_v15  ;;  %v2984_v15 = vld [vmem:[%s4406_s6 + $0x2] ss:$0 sm:$0xff] }
  0x41   :  { %3306 = vmatpush3.bf16.msra.mxu1 %v3592_v16  ;;  %3311 = vmatprep.subr.bf16.mxu0 %v3701_v1 }
  0x42   :  { %3319 = vmatprep.subr.bf16.mxu1 %v3701_v1 }
  0x43   :  { %3300 = vmatmul.mubr.msk.bf16.vlgmr.msra.gmra.mxu0 %vm124_vm1, %v3871_v12 }
  0x44   :  { %3308 = vmatmul.mubr.msk.bf16.vlgmr.msra.gmra.mxu1 %vm124_vm1, %v3871_v12  ;;  %3312 = vmatpush3.bf16.msra.mxu0 %v3593_v17 }
  0x45   :  { %3320 = vmatpush3.bf16.msra.mxu1 %v3594_v18  ;;  %3313 = vmatprep.subr.bf16.mxu0 %v3701_v1  ;;  %v2985_v18 = vld [vmem:[%s4406_s6 + $0x3] ss:$0 sm:$0xff] }
  0x46   :  { %3321 = vmatprep.subr.bf16.mxu1 %v3701_v1  ;;  %3315 = vmatprep.mubr.msk.bf16.mxu0 %vm3702_vm0, %v3701_v1 }
  0x47   :  { %3323 = vmatprep.mubr.msk.bf16.mxu1 %vm3702_vm0, %v3701_v1 }
  0x48   :  { %3314 = vmatpush3.bf16.msra.mxu0 %v3595_v19 }
  0x49   :  { %3322 = vmatpush3.bf16.msra.mxu1 %v3596_v20  ;;  %3327 = vmatprep.subr.bf16.mxu0 %v3701_v1 }
  0x4a   :  { %3335 = vmatprep.subr.bf16.mxu1 %v3701_v1 }
  0x4b   :  { %3316 = vmatmul.mubr.msk.bf16.vlgmr.msra.gmra.mxu0 %vm124_vm1, %v3871_v12 }
  0x4c   :  { %3324 = vmatmul.mubr.msk.bf16.vlgmr.msra.gmra.mxu1 %vm124_vm1, %v3871_v12  ;;  %3331 = vmatprep.mubr.msk.bf16.mxu0 %vm3702_vm0, %v3701_v1 }
  0x4d   :  { %3339 = vmatprep.mubr.msk.bf16.mxu1 %vm3702_vm0, %v3701_v1  ;;  %3328 = vmatpush3.bf16.msra.mxu0 %v3597_v21 }
  0x4e   :  { %3329 = vmatprep.subr.bf16.mxu0 %v3701_v1  ;;  %3336 = vmatpush3.bf16.msra.mxu1 %v3599_v23 }
  0x4f   :  { %3337 = vmatprep.subr.bf16.mxu1 %v3701_v1 }
  0x51   :  { %3330 = vmatpush3.bf16.msra.mxu0 %v3598_v22 }
  0x52   :  { %3343 = vmatprep.subr.bf16.mxu0 %v3701_v1  ;;  %3338 = vmatpush3.bf16.msra.mxu1 %v3600_v24 }
  0x53   :  { %3351 = vmatprep.subr.bf16.mxu1 %v3701_v1 }
  0x54   :  { %3332 = vmatmul.mubr.msk.bf16.vlgmr.msra.gmra.mxu0 %vm124_vm1, %v3830_v6 }
  0x55   :  { %3344 = vmatpush3.bf16.msra.mxu0 %v3601_v25  ;;  %3347 = vmatprep.mubr.msk.bf16.mxu0 %vm3702_vm0, %v3701_v1 }
  0x56   :  { %3345 = vmatprep.subr.bf16.mxu0 %v3701_v1  ;;  %3340 = vmatmul.mubr.msk.bf16.vlgmr.msra.gmra.mxu1 %vm124_vm1, %v3830_v6 }
  0x57   :  { %3352 = vmatpush3.bf16.msra.mxu1 %v3603_v27  ;;  %3355 = vmatprep.mubr.msk.bf16.mxu1 %vm3702_vm0, %v3701_v1 }
  0x58   :  { %3353 = vmatprep.subr.bf16.mxu1 %v3701_v1 }
  0x59   :  { %3346 = vmatpush3.bf16.msra.mxu0 %v3602_v26 }
  0x5a   :  { %3359 = vmatprep.subr.bf16.mxu0 %v3701_v1 }
  0x5b   :  { %3354 = vmatpush3.bf16.msra.mxu1 %v3604_v28 }
  0x5c   :  { %3348 = vmatmul.mubr.msk.bf16.vlgmr.msra.gmra.mxu0 %vm124_vm1, %v3830_v6  ;;  %3367 = vmatprep.subr.bf16.mxu1 %v3701_v1 }
  0x5d   :  { %3360 = vmatpush3.bf16.msra.mxu0 %v3597_v21  ;;  %3363 = vmatprep.mubr.msk.bf16.mxu0 %vm3702_vm0, %v3701_v1 }
  0x5e   :  { %3361 = vmatprep.subr.bf16.mxu0 %v3701_v1  ;;  %3356 = vmatmul.mubr.msk.bf16.vlgmr.msra.gmra.mxu1 %vm124_vm1, %v3830_v6 }
  0x5f   :  { %3368 = vmatpush3.bf16.msra.mxu1 %v3599_v23  ;;  %3371 = vmatprep.mubr.msk.bf16.mxu1 %vm3702_vm0, %v3701_v1 }
  0x60   :  { %3369 = vmatprep.subr.bf16.mxu1 %v3701_v1 }
  0x61   :  { %3362 = vmatpush3.bf16.msra.mxu0 %v3598_v22 }
  0x62   :  { %3375 = vmatprep.subr.bf16.mxu0 %v3701_v1 }
  0x63   :  { %3370 = vmatpush3.bf16.msra.mxu1 %v3600_v24 }
  0x64   :  { %3364 = vmatmul.mubr.msk.bf16.vlgmr.msra.gmra.mxu0 %vm124_vm1, %v3871_v12  ;;  %3383 = vmatprep.subr.bf16.mxu1 %v3701_v1 }
  0x65   :  { %3376 = vmatpush3.bf16.msra.mxu0 %v3601_v25  ;;  %3379 = vmatprep.mubr.msk.bf16.mxu0 %vm3702_vm0, %v3701_v1 }
  0x66   :  { %3377 = vmatprep.subr.bf16.mxu0 %v3701_v1  ;;  %3372 = vmatmul.mubr.msk.bf16.vlgmr.msra.gmra.mxu1 %vm124_vm1, %v3871_v12 }
  0x67   :  { %3384 = vmatpush3.bf16.msra.mxu1 %v3603_v27  ;;  %3387 = vmatprep.mubr.msk.bf16.mxu1 %vm3702_vm0, %v3701_v1 }
  0x68   :  { %3385 = vmatprep.subr.bf16.mxu1 %v3701_v1 }
  0x69   :  { %3378 = vmatpush3.bf16.msra.mxu0 %v3602_v26 }
  0x6a   :  { %3391 = vmatprep.subr.bf16.mxu0 %v3701_v1 }
  0x6b   :  { %3386 = vmatpush3.bf16.msra.mxu1 %v3604_v28 }
  0x6c   :  { %3380 = vmatmul.mubr.msk.bf16.vlgmr.msra.gmra.mxu0 %vm124_vm1, %v3871_v12  ;;  %3397 = vmatprep.subr.bf16.mxu1 %v3701_v1 }
  0x6d   :  { %3393 = vmatprep.mubr.msk.bf16.mxu0 %vm3702_vm0, %v3701_v1 }
  0x6e   :  { %3388 = vmatmul.mubr.msk.bf16.vlgmr.msra.gmra.mxu1 %vm124_vm1, %v3871_v12 }
  0x6f   :  { %3399 = vmatprep.mubr.msk.bf16.mxu1 %vm3702_vm0, %v3701_v1 }
  0xd3   :  { %v162_v29 = vpop.f32.mrf.mxu0  ;;  %v214_v30 = vpop.f32.mrf.mxu1 }
  0xd4   :  { %v163_v16 = vadd.f32 %v4060_v7, %v162_v29  ;;  %v215_v19 = vadd.f32 %v4065_v10, %v214_v30  ;;  %v4082_v29 = vld [vmem:[%s4405_s5 + $0x2] ss:$0 sm:$0xff]  ;;  %v4087_v30 = vld [vmem:[%s4405_s5 + $0x3] ss:$0 sm:$0xff] }
  0xd5   :  { %v3205_v31 = vpop.f32.mrf.mxu0  ;;  %v3213_v32 = vpop.f32.mrf.mxu1 }
  0xd6   :  { %v1313_v25 = vpack.c.bf16 %v163_v16, %v163_v16  ;;  %v1314_v28 = vpack.c.bf16 %v215_v19, %v215_v19  ;;  %v3003_v19 = vld [vmem:[%s4407_s7 + $0x1] ss:$0 sm:$0xff] }
  0xd7   :  { %v165_v33 = vpop.f32.mrf.mxu0  ;;  %v217_v34 = vpop.f32.mrf.mxu1 }
  0xd9   :  { %v3206_v35 = vpop.f32.mrf.mxu0  ;;  %v3214_v36 = vpop.f32.mrf.mxu1 }
  0xdb   :  { %v4039_v37 = vpop.f32.mrf.mxu0  ;;  %v4041_v38 = vpop.f32.mrf.mxu1 }
  0xdd   :  { %v3221_v39 = vpop.f32.mrf.mxu0  ;;  %v3229_v40 = vpop.f32.mrf.mxu1 }
  0xde   :  { %v267_v39 = vadd.f32 %v4082_v29, %v4039_v37 }
  0xdf   :  { %v269_v41 = vpop.f32.mrf.mxu0  ;;  %v321_v42 = vpop.f32.mrf.mxu1 }
  0xe0   :  { %v319_v41 = vadd.f32 %v4087_v30, %v4041_v38 }
  0xe1   :  { %v3222_v43 = vpop.f32.mrf.mxu0  ;;  %v3230_v44 = vpop.f32.mrf.mxu1 }
  0xe3   :  { %v4043_v45 = vpop.f32.mrf.mxu0  ;;  %v4045_v46 = vpop.f32.mrf.mxu1 }
  0xe5   :  { %v3237_v47 = vpop.f32.mrf.mxu0  ;;  %v3245_v48 = vpop.f32.mrf.mxu1 }
  0xe6   :  { %v1315_v48 = vpack.c.bf16 %v267_v39, %v267_v39 }
  0xe7   :  { %v364_v49 = vpop.f32.mrf.mxu0  ;;  %v404_v50 = vpop.f32.mrf.mxu1 }
  0xe9   :  { %v3238_v51 = vpop.f32.mrf.mxu0  ;;  %v3246_v52 = vpop.f32.mrf.mxu1 }
  0xea   :  { %v1316_v51 = vpack.c.bf16 %v319_v41, %v319_v41 }
  0xeb   :  { %v4047_v53 = vpop.f32.mrf.mxu0 }
  0xec   :  { %v4049_v54 = vpop.f32.mrf.mxu1 }
  0xed   :  { %v3253_v55 = vpop.f32.mrf.mxu0 }
  0xee   :  { %v3261_v56 = vpop.f32.mrf.mxu1 }
  0xef   :  { %v444_v57 = vpop.f32.mrf.mxu0 }
  0xf0   :  { %v484_v58 = vpop.f32.mrf.mxu1 }
  0xf1   :  { %v3254_v59 = vpop.f32.mrf.mxu0 }
  0xf2   :  { %v3262_v61 = vpop.f32.mrf.mxu1  ;;  %v362_v59 = vadd.f32 %v4060_v7, %v4043_v45 }
  0xf3   :  { %v577_v63 = vpop.f32.mrf.mxu0  ;;  %v402_v61 = vadd.f32 %v4065_v10, %v4045_v46 }
  0xf4   :  { %v578_v0 = vadd.f32 %v2982_v60, %v577_v63  ;;  %v629_v2 = vpop.f32.mrf.mxu1 }
  0xf5   :  { %v630_v3 = vadd.f32 %v2983_v62, %v629_v2  ;;  %v3269_v4 = vpop.f32.mrf.mxu0 }
  0xf6   :  { %v1321_v5 = vpack.c.bf16 %v578_v0, %v578_v0  ;;  %v3277_v6 = vpop.f32.mrf.mxu1 }
  0xf7   :  { %v1322_v8 = vpack.c.bf16 %v630_v3, %v630_v3  ;;  %v580_v9 = vpop.f32.mrf.mxu0  ;;  %v1317_v3 = vpack.c.bf16 %v362_v59, %v362_v59  ;;  %v1318_v6 = vpack.c.bf16 %v402_v61, %v402_v61 }
  0xf8   :  { %v1334_v11 = vsel %vm1329_vm2, %v1321_v5, 0  ;;  %v632_v12 = vpop.f32.mrf.mxu1 }
  0xf9   :  { %v1380_v13 = vsel %vm1329_vm2, %v1322_v8, 0  ;;  %v3270_v14 = vpop.f32.mrf.mxu0  ;;  %3392 = vmatpush3.bf16.xpose.msra.mxu0 %v1334_v11  ;;  %v442_v12 = vadd.f32 %v4082_v29, %v4047_v53  ;;  %v3002_v53 = vld [vmem:[%s4407_s7] ss:$0 sm:$0xff] }
  0xfa   :  { %v3278_v17 = vpop.f32.mrf.mxu1  ;;  %3398 = vmatpush3.bf16.xpose.msra.mxu1 %v1380_v13  ;;  %3403 = vmatprep.subr.bf16.mxu0 %v3701_v1  ;;  %v482_v14 = vadd.f32 %v4087_v30, %v4049_v54 }
  0xfb   :  { %v681_v20 = vpop.f32.mrf.mxu0  ;;  %3409 = vmatprep.subr.bf16.mxu1 %v3701_v1 }
  0xfc   :  { %v682_v21 = vadd.f32 %v2984_v15, %v681_v20  ;;  %v733_v22 = vpop.f32.mrf.mxu1  ;;  %v1320_v16 = vpack.c.bf16 %v482_v14, %v482_v14 }
  0xfd   :  { %v734_v23 = vadd.f32 %v2985_v18, %v733_v22  ;;  %v3285_v24 = vpop.f32.mrf.mxu0 }
  0xfe   :  { %v1323_v26 = vpack.c.bf16 %v682_v21, %v682_v21  ;;  %v3293_v27 = vpop.f32.mrf.mxu1 }
  0xff   :  { %v1324_v31 = vpack.c.bf16 %v734_v23, %v734_v23  ;;  %v684_v32 = vpop.f32.mrf.mxu0 }
 0x100   :  { %v1426_v33 = vsel %vm1329_vm2, %v1323_v26, 0  ;;  %v736_v34 = vpop.f32.mrf.mxu1  ;;  %3394 = vmatmul.mubr.msk.bf16.vlgmr.msra.gmra.mxu0 %vm1329_vm2, %v1313_v25 }
 0x101   :  { %v1472_v35 = vsel %vm1329_vm2, %v1324_v31, 0  ;;  %3400 = vmatmul.mubr.msk.bf16.vlgmr.msra.gmra.mxu1 %vm1329_vm2, %v1314_v28  ;;  %v3286_v36 = vpop.f32.mrf.mxu0  ;;  %3404 = vmatpush3.bf16.xpose.msra.mxu0 %v1426_v33 }
 0x102   :  { %v3294_v40 = vpop.f32.mrf.mxu1  ;;  %3410 = vmatpush3.bf16.xpose.msra.mxu1 %v1472_v35  ;;  %3405 = vmatprep.mubr.msk.bf16.mxu0 %vm3702_vm0, %v3701_v1 }
 0x103   :  { %v773_v42 = vpop.f32.mrf.mxu0  ;;  %3411 = vmatprep.mubr.msk.bf16.mxu1 %vm3702_vm0, %v3701_v1  ;;  %3415 = vmatprep.subr.bf16.mxu0 %v3701_v1 }
 0x104   :  { %v774_v43 = vadd.f32 %v2982_v60, %v773_v42  ;;  %v813_v44 = vpop.f32.mrf.mxu1  ;;  %3421 = vmatprep.subr.bf16.mxu1 %v3701_v1 }
 0x105   :  { %v814_v47 = vadd.f32 %v2983_v62, %v813_v44  ;;  %v3301_v37 = vpop.f32.mrf.mxu0 }
 0x106   :  { %v1325_v49 = vpack.c.bf16 %v774_v43, %v774_v43  ;;  %v3309_v50 = vpop.f32.mrf.mxu1 }
 0x107   :  { %v1326_v52 = vpack.c.bf16 %v814_v47, %v814_v47  ;;  %v776_v55 = vpop.f32.mrf.mxu0 }
 0x108   :  { %v1518_v38 = vsel %vm1329_vm2, %v1325_v49, 0  ;;  %v816_v56 = vpop.f32.mrf.mxu1  ;;  %3406 = vmatmul.mubr.msk.bf16.vlgmr.msra.gmra.mxu0 %vm1329_vm2, %v1315_v48 }
 0x109   :  { %v1564_v57 = vsel %vm1329_vm2, %v1326_v52, 0  ;;  %3412 = vmatmul.mubr.msk.bf16.vlgmr.msra.gmra.mxu1 %vm1329_vm2, %v1316_v51  ;;  %v3302_v58 = vpop.f32.mrf.mxu0  ;;  %3416 = vmatpush3.bf16.xpose.msra.mxu0 %v1518_v38 }
 0x10a   :  { %v3310_v60 = vpop.f32.mrf.mxu1  ;;  %3422 = vmatpush3.bf16.xpose.msra.mxu1 %v1564_v57  ;;  %3417 = vmatprep.mubr.msk.bf16.mxu0 %vm3702_vm0, %v3701_v1 }
 0x10b   :  { %v853_v62 = vpop.f32.mrf.mxu0  ;;  %3423 = vmatprep.mubr.msk.bf16.mxu1 %vm3702_vm0, %v3701_v1  ;;  %3427 = vmatprep.subr.bf16.mxu0 %v3701_v1 }
 0x10c   :  { %v854_v63 = vadd.f32 %v2984_v15, %v853_v62  ;;  %v893_v0 = vpop.f32.mrf.mxu1  ;;  %3433 = vmatprep.subr.bf16.mxu1 %v3701_v1  ;;  %v1319_v15 = vpack.c.bf16 %v442_v12, %v442_v12  ;;  %v1311_v62 = vld [vmem:[%s4431_s21] sm:$0xff] }
 0x10d   :  { %v894_v2 = vadd.f32 %v2985_v18, %v893_v0  ;;  %v3317_v45 = vpop.f32.mrf.mxu0 }
 0x10e   :  { %v1327_v4 = vpack.c.bf16 %v854_v63, %v854_v63  ;;  %v3325_v5 = vpop.f32.mrf.mxu1 }
 0x10f   :  { %v1328_v7 = vpack.c.bf16 %v894_v2, %v894_v2  ;;  %v856_v8 = vpop.f32.mrf.mxu0 }
 0x110   :  { %v1610_v46 = vsel %vm1329_vm2, %v1327_v4, 0  ;;  %v896_v9 = vpop.f32.mrf.mxu1  ;;  %3418 = vmatmul.mubr.msk.bf16.vlgmr.msra.gmra.mxu0 %vm1329_vm2, %v1317_v3 }
 0x111   :  { %v1656_v10 = vsel %vm1329_vm2, %v1328_v7, 0  ;;  %3424 = vmatmul.mubr.msk.bf16.vlgmr.msra.gmra.mxu1 %vm1329_vm2, %v1318_v6  ;;  %v3318_v11 = vpop.f32.mrf.mxu0  ;;  %3428 = vmatpush3.bf16.xpose.msra.mxu0 %v1610_v46 }
 0x112   :  { %v3326_v13 = vpop.f32.mrf.mxu1  ;;  %3434 = vmatpush3.bf16.xpose.msra.mxu1 %v1656_v10  ;;  %3429 = vmatprep.mubr.msk.bf16.mxu0 %vm3702_vm0, %v3701_v1 }
 0x113   :  { %3435 = vmatprep.mubr.msk.bf16.mxu1 %vm3702_vm0, %v3701_v1  ;;  %3439 = vmatprep.subr.bf16.mxu0 %v3701_v1 }
 0x114   :  { %3445 = vmatprep.subr.bf16.mxu1 %v3701_v1  ;;  %v989_v54 = vpop.f32.mrf.mxu0 }
 0x115   :  { %v990_v17 = vadd.f32 %v3002_v53, %v989_v54 }
 0x116   :  { %v3333_v18 = vpop.f32.mrf.mxu0  ;;  %v1041_v22 = vpop.f32.mrf.mxu1 }
 0x117   :  { %v1818_v20 = vpack.c.bf16 %v990_v17, %v990_v17  ;;  %v1042_v24 = vadd.f32 %v3003_v19, %v1041_v22 }
 0x118   :  { %3430 = vmatmul.mubr.msk.bf16.vlgmr.msra.gmra.mxu0 %vm1329_vm2, %v1319_v15  ;;  %v992_v21 = vpop.f32.mrf.mxu0  ;;  %v3341_v26 = vpop.f32.mrf.mxu1 }
 0x119   :  { %3436 = vmatmul.mubr.msk.bf16.vlgmr.msra.gmra.mxu1 %vm1329_vm2, %v1320_v16  ;;  %3441 = vmatprep.mubr.msk.bf16.mxu0 %vm3702_vm0, %v3701_v1  ;;  %v1831_v23 = vsel %vm1829_vm3, %v1818_v20, 0  ;;  %v1819_v27 = vpack.c.bf16 %v1042_v24, %v1042_v24 }
 0x11a   :  { %3447 = vmatprep.mubr.msk.bf16.mxu1 %vm3702_vm0, %v3701_v1  ;;  %v3334_v25 = vpop.f32.mrf.mxu0  ;;  %3440 = vmatpush3.bf16.msra.mxu0 %v1831_v23  ;;  %v1044_v28 = vpop.f32.mrf.mxu1  ;;  %v1312_v23 = vld [vmem:[%s4431_s21 + $0x8] sm:$0xff] }
 0x11b   :  { %3451 = vmatprep.subr.bf16.mxu0 %v3701_v1  ;;  %v1877_v31 = vsel %vm1829_vm3, %v1819_v27, 0 }
 0x11c   :  { %v4145_v29 = vpop.f32.mrf.mxu0  ;;  %v3342_v32 = vpop.f32.mrf.mxu1  ;;  %3446 = vmatpush3.bf16.msra.mxu1 %v1877_v31 }
 0x11d   :  { %3457 = vmatprep.subr.bf16.mxu1 %v3701_v1 }
 0x11e   :  { %v3349_v30 = vpop.f32.mrf.mxu0  ;;  %v4149_v34 = vpop.f32.mrf.mxu1 }
 0x120   :  { %v1096_v33 = vpop.f32.mrf.mxu0  ;;  %v3357_v36 = vpop.f32.mrf.mxu1 }
 0x122   :  { %v3350_v35 = vpop.f32.mrf.mxu0  ;;  %v1148_v39 = vpop.f32.mrf.mxu1 }
 0x124   :  { %v1185_v40 = vpop.f32.mrf.mxu0  ;;  %v3358_v42 = vpop.f32.mrf.mxu1 }
 0x125   :  { %v4151_v41 = vadd.f32 %v3002_v53, %v1185_v40 }
 0x126   :  { %v3365_v43 = vpop.f32.mrf.mxu0  ;;  %v1225_v47 = vpop.f32.mrf.mxu1 }
 0x127   :  { %v4153_v37 = vadd.f32 %v3003_v19, %v1225_v47 }
 0x128   :  { %v1188_v44 = vpop.f32.mrf.mxu0  ;;  %v3373_v49 = vpop.f32.mrf.mxu1 }
 0x12a   :  { %v3366_v48 = vpop.f32.mrf.mxu0  ;;  %v1228_v50 = vpop.f32.mrf.mxu1 }
 0x12c   :  { %v4155_v51 = vpop.f32.mrf.mxu0  ;;  %v3374_v52 = vpop.f32.mrf.mxu1 }
 0x12e   :  { %v3381_v55 = vpop.f32.mrf.mxu0  ;;  %v4157_v56 = vpop.f32.mrf.mxu1 }
 0x130   :  { %v1268_v38 = vpop.f32.mrf.mxu0  ;;  %v3389_v58 = vpop.f32.mrf.mxu1 }
 0x132   :  { %v3382_v57 = vpop.f32.mrf.mxu0  ;;  %v1308_v59 = vpop.f32.mrf.mxu1 }
 0x134   :  { %v3390_v60 = vpop.f32.mrf.mxu1 }
 0x1c0   :  { %v1370_v61 = vpop.f32.mrf.mxu0 }
 0x1c1   :  { %v1698_v63 = vmul.f32 0.35355338, %v1370_v61  ;;  %v1416_v0 = vpop.f32.mrf.mxu1 }
 0x1c2   :  { %v1699_v2 = vmul.f32 0.35355338, %v1416_v0  ;;  %v3395_v45 = vpop.f32.mrf.mxu0 }
 0x1c3   :  { %v3401_v3 = vpop.f32.mrf.mxu1  ;;  %v1706_v4 = vadd.f32 %v1698_v63, %v1311_v62 }
 0x1c4   :  { %v1373_v5 = vpop.f32.mrf.mxu0  ;;  %v1707_v8 = vadd.f32 %v1699_v2, %v1311_v62 }
 0x1c5   :  { %v1419_v6 = vpop.f32.mrf.mxu1  ;;  %v1714_v7 = vsel %vm1329_vm2, %v1706_v4, -inf }
 0x1c6   :  { %1715 = vmax.xlane.f32.xlu0 %v1714_v7  ;;  %v3396_v46 = vpop.f32.mrf.mxu0  ;;  %v1717_v13 = vsel %vm1329_vm2, %v1707_v8, -inf }
 0x1c7   :  { %v3402_v9 = vpop.f32.mrf.mxu1 }
 0x1c8   :  { %v1462_v10 = vpop.f32.mrf.mxu0 }
 0x1c9   :  { %v1700_v11 = vmul.f32 0.35355338, %v1462_v10  ;;  %v1508_v12 = vpop.f32.mrf.mxu1 }
 0x1ca   :  { %v1701_v14 = vmul.f32 0.35355338, %v1508_v12  ;;  %1718 = vmax.xlane.f32.xlu0 %v1717_v13  ;;  %v3407_v15 = vpop.f32.mrf.mxu0 }
 0x1cb   :  { %v3413_v16 = vpop.f32.mrf.mxu1  ;;  %v1708_v53 = vadd.f32 %v1700_v11, %v1311_v62 }
 0x1cc   :  { %v1465_v54 = vpop.f32.mrf.mxu0  ;;  %v1709_v19 = vadd.f32 %v1701_v14, %v1311_v62 }
 0x1cd   :  { %v1511_v17 = vpop.f32.mrf.mxu1  ;;  %v1720_v18 = vsel %vm1329_vm2, %v1708_v53, -inf }
 0x1ce   :  { %1721 = vmax.xlane.f32.xlu1 %v1720_v18  ;;  %v3408_v20 = vpop.f32.mrf.mxu0  ;;  %v1723_v26 = vsel %vm1329_vm2, %v1709_v19, -inf }
 0x1cf   :  { %v3414_v21 = vpop.f32.mrf.mxu1 }
 0x1d0   :  { %v1554_v22 = vpop.f32.mrf.mxu0 }
 0x1d1   :  { %v1702_v24 = vmul.f32 0.35355338, %v1554_v22  ;;  %v1600_v25 = vpop.f32.mrf.mxu1 }
 0x1d2   :  { %v1703_v27 = vmul.f32 0.35355338, %v1600_v25  ;;  %1724 = vmax.xlane.f32.xlu1 %v1723_v26  ;;  %v3419_v28 = vpop.f32.mrf.mxu0 }
 0x1d3   :  { %v3425_v31 = vpop.f32.mrf.mxu1  ;;  %v1710_v32 = vadd.f32 %v1702_v24, %v1312_v23 }
 0x1d4   :  { %v1557_v30 = vpop.f32.mrf.mxu0  ;;  %v1711_v33 = vadd.f32 %v1703_v27, %v1312_v23 }
 0x1d5   :  { %v1603_v35 = vpop.f32.mrf.mxu1  ;;  %v1726_v36 = vsel %vm1329_vm2, %v1710_v32, -inf }
 0x1d6   :  { %v1729_v39 = vsel %vm1329_vm2, %v1711_v33, -inf  ;;  %1727 = vmax.xlane.f32.xlu0 %v1726_v36  ;;  %v3420_v40 = vpop.f32.mrf.mxu0 }
 0x1d7   :  { %v3426_v42 = vpop.f32.mrf.mxu1  ;;  %1730 = vmax.xlane.f32.xlu1 %v1729_v39 }
 0x1d8   :  { %v1646_v43 = vpop.f32.mrf.mxu0  ;;  %v3004_v42 = vld [vmem:[%s4407_s7 + $0x2] ss:$0 sm:$0xff] }
 0x1d9   :  { %v1704_v44 = vmul.f32 0.35355338, %v1646_v43  ;;  %v1692_v47 = vpop.f32.mrf.mxu1 }
 0x1da   :  { %v1705_v48 = vmul.f32 0.35355338, %v1692_v47  ;;  %v3431_v49 = vpop.f32.mrf.mxu0  ;;  %v3005_v47 = vld [vmem:[%s4407_s7 + $0x3] ss:$0 sm:$0xff] }
 0x1db   :  { %v3437_v50 = vpop.f32.mrf.mxu1  ;;  %v1712_v52 = vadd.f32 %v1704_v44, %v1312_v23  ;;  %v1094_v44 = vadd.f32 %v3004_v42, %v4145_v29 }
 0x1dc   :  { %v1649_v55 = vpop.f32.mrf.mxu0  ;;  %v1713_v38 = vadd.f32 %v1705_v48, %v1312_v23 }
 0x1dd   :  { %v1695_v57 = vpop.f32.mrf.mxu1  ;;  %v1732_v58 = vsel %vm1329_vm2, %v1712_v52, -inf  ;;  %v1820_v50 = vpack.c.bf16 %v1094_v44, %v1094_v44 }
 0x1de   :  { %v1735_v59 = vsel %vm1329_vm2, %v1713_v38, -inf  ;;  %1733 = vmax.xlane.f32.xlu0 %v1732_v58  ;;  %v3432_v60 = vpop.f32.mrf.mxu0 }
 0x1df   :  { %v3438_v61 = vpop.f32.mrf.mxu1  ;;  %1736 = vmax.xlane.f32.xlu1 %v1735_v59  ;;  %v1923_v29 = vsel %vm1829_vm3, %v1820_v50, 0 }
 0x24f   :  { %v1716_v62 = vpop.xlane.xlu0 %1715 }
 0x250   :  { %v1738_v63 = vsub.f32 %v1706_v4, %v1716_v62 }
 0x252   :  { %v1746_v0 = vmul.f32 1.442695, %v1738_v63 }
 0x253   :  { %v1719_v2 = vpop.xlane.xlu0 %1718 }
 0x254   :  { %3611 = vpow2.f32 %v1746_v0  ;;  %v1739_v45 = vsub.f32 %v1707_v8, %v1719_v2  ;;  %v1822_v0 = vpack.c.bf16 %v4151_v41, %v4151_v41  ;;  %v1823_v41 = vpack.c.bf16 %v4153_v37, %v4153_v37 }
 0x256   :  { %v1748_v3 = vmul.f32 1.442695, %v1739_v45 }
 0x257   :  { %v1722_v5 = vpop.xlane.xlu1 %1721 }
 0x258   :  { %3613 = vpow2.f32 %v1748_v3  ;;  %v1740_v6 = vsub.f32 %v1708_v53, %v1722_v5 }
 0x25a   :  { %v1750_v7 = vmul.f32 1.442695, %v1740_v6 }
 0x25b   :  { %v1725_v46 = vpop.xlane.xlu1 %1724 }
 0x25c   :  { %3615 = vpow2.f32 %v1750_v7  ;;  %v1741_v9 = vsub.f32 %v1709_v19, %v1725_v46  ;;  %v2015_v7 = vsel %vm1829_vm3, %v1822_v0, 0  ;;  %v1266_v46 = vadd.f32 %v3004_v42, %v4155_v51 }
 0x25d   :  { %v1306_v51 = vadd.f32 %v3005_v47, %v4157_v56 }
 0x25e   :  { %v1752_v10 = vmul.f32 1.442695, %v1741_v9  ;;  %v1824_v37 = vpack.c.bf16 %v1266_v46, %v1266_v46 }
 0x25f   :  { %v1728_v11 = vpop.xlane.xlu0 %1727  ;;  %v1825_v56 = vpack.c.bf16 %v1306_v51, %v1306_v51 }
 0x260   :  { %3617 = vpow2.f32 %v1752_v10  ;;  %v1731_v12 = vpop.xlane.xlu1 %1730  ;;  %v1742_v13 = vsub.f32 %v1710_v32, %v1728_v11 }
 0x261   :  { %v3612_v14 = vpop.eup %3611  ;;  %v1743_v15 = vsub.f32 %v1711_v33, %v1731_v12 }
 0x262   :  { %v1754_v4 = vmul.f32 1.442695, %v1742_v13  ;;  %v1762_v16 = vsel %vm1329_vm2, %v3612_v14, 0.0  ;;  %v2061_v13 = vsel %vm1829_vm3, %v1823_v41, 0 }
 0x263   :  { %v1756_v54 = vmul.f32 1.442695, %v1743_v15  ;;  %1763 = vadd.xlane.f32.xlu0 %v1762_v16  ;;  %v2107_v16 = vsel %vm1829_vm3, %v1824_v37, 0 }
 0x264   :  { %3619 = vpow2.f32 %v1754_v4 }
 0x265   :  { %v3614_v8 = vpop.eup %3613  ;;  %3621 = vpow2.f32 %v1756_v54 }
 0x266   :  { %v1765_v53 = vsel %vm1329_vm2, %v3614_v8, 0.0 }
 0x267   :  { %1766 = vadd.xlane.f32.xlu1 %v1765_v53  ;;  %v1734_v17 = vpop.xlane.xlu0 %1733  ;;  %v2203_v53 = vld [vmem:[%s4408_s8] sm:$0xf] }
 0x268   :  { %v1737_v18 = vpop.xlane.xlu1 %1736  ;;  %v1744_v19 = vsub.f32 %v1712_v52, %v1734_v17  ;;  %v1146_v52 = vadd.f32 %v3005_v47, %v4149_v34 }
 0x269   :  { %v3616_v20 = vpop.eup %3615  ;;  %v1745_v21 = vsub.f32 %v1713_v38, %v1737_v18  ;;  %v2153_v18 = vsel %vm1829_vm3, %v1825_v56, 0 }
 0x26a   :  { %v1758_v22 = vmul.f32 1.442695, %v1744_v19  ;;  %v1768_v23 = vsel %vm1329_vm2, %v3616_v20, 0.0  ;;  %v1821_v60 = vpack.c.bf16 %v1146_v52, %v1146_v52 }
 0x26b   :  { %v1760_v24 = vmul.f32 1.442695, %v1745_v21  ;;  %1769 = vadd.xlane.f32.xlu0 %v1768_v23 }
 0x26c   :  { %3623 = vpow2.f32 %v1758_v22  ;;  %v1969_v63 = vsel %vm1829_vm3, %v1821_v60, 0  ;;  %v2211_v22 = vsel %vm1829_vm3, %v2203_v53, 0 }
 0x26d   :  { %v4176_v25 = vpop.eup %3617  ;;  %3625 = vpow2.f32 %v1760_v24  ;;  %v2204_v24 = vld [vmem:[%s4408_s8 + $0x4] sm:$0xf] }
 0x26e   :  { %v1771_v26 = vsel %vm1329_vm2, %v4176_v25, 0.0 }
 0x26f   :  { %1772 = vadd.xlane.f32.xlu1 %v1771_v26  ;;  %v2205_v26 = vld [vmem:[%s4408_s8 + $0x8] sm:$0xf] }
 0x271   :  { %v4180_v27 = vpop.eup %3619 }
 0x272   :  { %v4182_v28 = vpop.eup %3621  ;;  %v1774_v31 = vsel %vm1329_vm2, %v4180_v27, 0.0 }
 0x273   :  { %v1777_v32 = vsel %vm1329_vm2, %v4182_v28, 0.0  ;;  %1775 = vadd.xlane.f32.xlu0 %v1774_v31  ;;  %v2303_v31 = vsel %vm1829_vm3, %v2205_v26, 0 }
 0x274   :  { %1778 = vadd.xlane.f32.xlu1 %v1777_v32 }
 0x279   :  { %v4188_v30 = vpop.eup %3623 }
 0x27a   :  { %v4190_v33 = vpop.eup %3625  ;;  %v1780_v35 = vsel %vm1329_vm2, %v4188_v30, 0.0 }
 0x27b   :  { %v1783_v36 = vsel %vm1329_vm2, %v4190_v33, 0.0  ;;  %1781 = vadd.xlane.f32.xlu0 %v1780_v35 }
 0x27c   :  { %1784 = vadd.xlane.f32.xlu1 %v1783_v36 }
 0x2ec   :  { %v1764_v39 = vpop.xlane.xlu0 %1763 }
 0x2ed   :  { %3627 = vrcp.f32 %v1764_v39 }
 0x2f0   :  { %v1767_v40 = vpop.xlane.xlu1 %1766 }
 0x2f1   :  { %3629 = vrcp.f32 %v1767_v40 }
 0x2f4   :  { %v1770_v43 = vpop.xlane.xlu0 %1769 }
 0x2f5   :  { %3631 = vrcp.f32 %v1770_v43 }
 0x2f8   :  { %v1773_v48 = vpop.xlane.xlu1 %1772 }
 0x2f9   :  { %3633 = vrcp.f32 %v1773_v48 }
 0x2fa   :  { %v3628_v49 = vpop.eup %3627 }
 0x2fb   :  { %v1794_v55 = vmul.f32 %v3628_v49, %v3612_v14 }
 0x2fc   :  { %v1776_v38 = vpop.xlane.xlu0 %1775 }
 0x2fd   :  { %v1779_v57 = vpop.xlane.xlu1 %1778  ;;  %3635 = vrcp.f32 %v1776_v38  ;;  %1802 = vst.msk [vmem:[#allocation4] sm:$0xff] %vm1329_vm2, %v1794_v55  ;;  %v1810_v58 = vpack.c.bf16 %v1794_v55, %v1794_v55 }
 0x2fe   :  { %v3630_v59 = vpop.eup %3629  ;;  %3637 = vrcp.f32 %v1779_v57 }
 0x2ff   :  { %3442 = vmatmul.mubr.msk.bf16.vlgmr.msra.gmra.mxu0 %vm1329_vm2, %v1810_v58  ;;  %v1795_v61 = vmul.f32 %v3630_v59, %v3614_v8 }
 0x300   :  { %3452 = vmatpush3.bf16.msra.mxu0 %v1923_v29  ;;  %3453 = vmatprep.mubr.msk.bf16.mxu0 %vm3702_vm0, %v3701_v1 }
 0x301   :  { %1803 = vst.msk [vmem:[#allocation4 + $0x8] sm:$0xff] %vm1329_vm2, %v1795_v61  ;;  %v1811_v34 = vpack.c.bf16 %v1795_v61, %v1795_v61  ;;  %3463 = vmatprep.subr.bf16.mxu0 %v3701_v1 }
 0x302   :  { %v3632_v62 = vpop.eup %3631 }
 0x303   :  { %3448 = vmatmul.mubr.msk.bf16.vlgmr.msra.gmra.mxu1 %vm1329_vm2, %v1811_v34  ;;  %v1796_v2 = vmul.f32 %v3632_v62, %v3616_v20 }
 0x304   :  { %3458 = vmatpush3.bf16.msra.mxu1 %v1969_v63  ;;  %v1782_v45 = vpop.xlane.xlu0 %1781  ;;  %3459 = vmatprep.mubr.msk.bf16.mxu1 %vm3702_vm0, %v3701_v1 }
 0x305   :  { %v1785_v3 = vpop.xlane.xlu1 %1784  ;;  %3639 = vrcp.f32 %v1782_v45  ;;  %1804 = vst.msk [vmem:[#allocation4 + $0x10] sm:$0xff] %vm1329_vm2, %v1796_v2  ;;  %v1812_v5 = vpack.c.bf16 %v1796_v2, %v1796_v2  ;;  %3469 = vmatprep.subr.bf16.mxu1 %v3701_v1 }
 0x306   :  { %v3634_v6 = vpop.eup %3633  ;;  %3641 = vrcp.f32 %v1785_v3 }
 0x307   :  { %3454 = vmatmul.mubr.msk.bf16.vlgmr.msra.gmra.mxu0 %vm1329_vm2, %v1812_v5  ;;  %v1797_v9 = vmul.f32 %v3634_v6, %v4176_v25  ;;  %v2257_v25 = vsel %vm1829_vm3, %v2204_v24, 0 }
 0x308   :  { %3464 = vmatpush3.bf16.msra.mxu0 %v2015_v7  ;;  %3465 = vmatprep.mubr.msk.bf16.mxu0 %vm3702_vm0, %v3701_v1 }
 0x309   :  { %1805 = vst.msk [vmem:[#allocation4 + $0x18] sm:$0xff] %vm1329_vm2, %v1797_v9  ;;  %v1813_v10 = vpack.c.bf16 %v1797_v9, %v1797_v9  ;;  %3475 = vmatprep.subr.bf16.mxu0 %v3701_v1 }
 0x30a   :  { %v3636_v11 = vpop.eup %3635 }
 0x30b   :  { %v3638_v12 = vpop.eup %3637  ;;  %3460 = vmatmul.mubr.msk.bf16.vlgmr.msra.gmra.mxu1 %vm1329_vm2, %v1813_v10  ;;  %v1798_v14 = vmul.f32 %v3636_v11, %v4180_v27 }
 0x30c   :  { %3470 = vmatpush3.bf16.msra.mxu1 %v2061_v13  ;;  %3471 = vmatprep.mubr.msk.bf16.mxu1 %vm3702_vm0, %v3701_v1  ;;  %v1799_v15 = vmul.f32 %v3638_v12, %v4182_v28 }
 0x30d   :  { %1806 = vst.msk [vmem:[#allocation4 + $0x20] sm:$0xff] %vm1329_vm2, %v1798_v14  ;;  %v1814_v4 = vpack.c.bf16 %v1798_v14, %v1798_v14  ;;  %3481 = vmatprep.subr.bf16.mxu1 %v3701_v1 }
 0x30e   :  { %1807 = vst.msk [vmem:[#allocation4 + $0x28] sm:$0xff] %vm1329_vm2, %v1799_v15  ;;  %v1815_v54 = vpack.c.bf16 %v1799_v15, %v1799_v15 }
 0x30f   :  { %3466 = vmatmul.mubr.msk.bf16.vlgmr.msra.gmra.mxu0 %vm1329_vm2, %v1814_v4 }
 0x310   :  { %3476 = vmatpush3.bf16.msra.mxu0 %v2107_v16  ;;  %3477 = vmatprep.mubr.msk.bf16.mxu0 %vm3702_vm0, %v3701_v1 }
 0x311   :  { %3487 = vmatprep.subr.bf16.mxu0 %v3701_v1 }
 0x312   :  { %v3640_v8 = vpop.eup %3639 }
 0x313   :  { %v3642_v17 = vpop.eup %3641  ;;  %3472 = vmatmul.mubr.msk.bf16.vlgmr.msra.gmra.mxu1 %vm1329_vm2, %v1815_v54  ;;  %v1800_v19 = vmul.f32 %v3640_v8, %v4188_v30  ;;  %v2206_v30 = vld [vmem:[%s4408_s8 + $0xc] sm:$0xf] }
 0x314   :  { %3482 = vmatpush3.bf16.msra.mxu1 %v2153_v18  ;;  %3483 = vmatprep.mubr.msk.bf16.mxu1 %vm3702_vm0, %v3701_v1  ;;  %v1801_v20 = vmul.f32 %v3642_v17, %v4190_v33  ;;  %v2349_v39 = vsel %vm1829_vm3, %v2206_v30, 0 }
 0x315   :  { %1808 = vst.msk [vmem:[#allocation4 + $0x30] sm:$0xff] %vm1329_vm2, %v1800_v19  ;;  %v1816_v21 = vpack.c.bf16 %v1800_v19, %v1800_v19  ;;  %3493 = vmatprep.subr.bf16.mxu1 %v3701_v1 }
 0x316   :  { %1809 = vst.msk [vmem:[#allocation4 + $0x38] sm:$0xff] %vm1329_vm2, %v1801_v20  ;;  %v1817_v23 = vpack.c.bf16 %v1801_v20, %v1801_v20 }
 0x317   :  { %3478 = vmatmul.mubr.msk.bf16.vlgmr.msra.gmra.mxu0 %vm1329_vm2, %v1816_v21  ;;  %v3046_v21 = vld [vmem:[%s4409_s9] ss:$0 sm:$0xff] }
 0x318   :  { %3488 = vmatpush3.bf16.msra.mxu0 %v2211_v22  ;;  %3489 = vmatprep.mubr.msk.bf16.mxu0 %vm3702_vm0, %v3701_v1 }
 0x319   :  { %3499 = vmatprep.subr.bf16.mxu0 %v3701_v1 }
 0x31b   :  { %3484 = vmatmul.mubr.msk.bf16.vlgmr.msra.gmra.mxu1 %vm1329_vm2, %v1817_v23 }
 0x31c   :  { %3495 = vmatprep.mubr.msk.bf16.mxu1 %vm3702_vm0, %v3701_v1  ;;  %3494 = vmatpush3.bf16.msra.mxu1 %v2257_v25 }
 0x31d   :  { %3505 = vmatprep.subr.bf16.mxu1 %v3701_v1 }
 0x3bf   :  { %v1867_v27 = vpop.f32.mrf.mxu0 }
 0x3c0   :  { %v2195_v28 = vpack.c.bf16 %v1867_v27, %v1867_v27 }
 0x3c1   :  { %v3443_v32 = vpop.f32.mrf.mxu0 }
 0x3c2   :  { %3490 = vmatmul.mubr.msk.bf16.vlgmr.msra.gmra.mxu0 %vm1329_vm2, %v2195_v28 }
 0x3c3   :  { %v1870_v33 = vpop.f32.mrf.mxu0  ;;  %v1913_v35 = vpop.f32.mrf.mxu1  ;;  %3500 = vmatpush3.bf16.msra.mxu0 %v2303_v31  ;;  %3501 = vmatprep.mubr.msk.bf16.mxu0 %vm3702_vm0, %v3701_v1 }
 0x3c4   :  { %v2196_v36 = vpack.c.bf16 %v1913_v35, %v1913_v35  ;;  %3511 = vmatprep.subr.bf16.mxu0 %v3701_v1 }
 0x3c5   :  { %v3444_v40 = vpop.f32.mrf.mxu0  ;;  %v3449_v42 = vpop.f32.mrf.mxu1 }
 0x3c6   :  { %3496 = vmatmul.mubr.msk.bf16.vlgmr.msra.gmra.mxu1 %vm1329_vm2, %v2196_v36 }
 0x3c7   :  { %v1916_v43 = vpop.f32.mrf.mxu1  ;;  %v1959_v44 = vpop.f32.mrf.mxu0  ;;  %3506 = vmatpush3.bf16.msra.mxu1 %v2349_v39  ;;  %3507 = vmatprep.mubr.msk.bf16.mxu1 %vm3702_vm0, %v3701_v1 }
 0x3c8   :  { %v2197_v47 = vpack.c.bf16 %v1959_v44, %v1959_v44  ;;  %3517 = vmatprep.subr.bf16.mxu1 %v3701_v1 }
 0x3c9   :  { %v3450_v48 = vpop.f32.mrf.mxu1  ;;  %v3455_v49 = vpop.f32.mrf.mxu0 }
 0x3ca   :  { %3502 = vmatmul.mubr.msk.bf16.vlgmr.msra.gmra.mxu0 %vm1329_vm2, %v2197_v47 }
 0x3cb   :  { %v1962_v50 = vpop.f32.mrf.mxu0  ;;  %v2005_v52 = vpop.f32.mrf.mxu1  ;;  %3512 = vmatpush3.bf16.msra.mxu0 %v2211_v22  ;;  %3513 = vmatprep.mubr.msk.bf16.mxu0 %vm3702_vm0, %v3701_v1 }
 0x3cc   :  { %v2198_v55 = vpack.c.bf16 %v2005_v52, %v2005_v52  ;;  %3523 = vmatprep.subr.bf16.mxu0 %v3701_v1 }
 0x3cd   :  { %v3456_v38 = vpop.f32.mrf.mxu0  ;;  %v3461_v57 = vpop.f32.mrf.mxu1 }
 0x3ce   :  { %3508 = vmatmul.mubr.msk.bf16.vlgmr.msra.gmra.mxu1 %vm1329_vm2, %v2198_v55 }
 0x3cf   :  { %v2008_v58 = vpop.f32.mrf.mxu1  ;;  %v2051_v59 = vpop.f32.mrf.mxu0  ;;  %3518 = vmatpush3.bf16.msra.mxu1 %v2257_v25  ;;  %3519 = vmatprep.mubr.msk.bf16.mxu1 %vm3702_vm0, %v3701_v1 }
 0x3d0   :  { %v2199_v29 = vpack.c.bf16 %v2051_v59, %v2051_v59  ;;  %3529 = vmatprep.subr.bf16.mxu1 %v3701_v1 }
 0x3d1   :  { %v3462_v60 = vpop.f32.mrf.mxu1  ;;  %v3467_v61 = vpop.f32.mrf.mxu0 }
 0x3d2   :  { %3514 = vmatmul.mubr.msk.bf16.vlgmr.msra.gmra.mxu0 %vm1329_vm2, %v2199_v29 }
 0x3d3   :  { %v2054_v34 = vpop.f32.mrf.mxu0  ;;  %v2097_v62 = vpop.f32.mrf.mxu1  ;;  %3524 = vmatpush3.bf16.msra.mxu0 %v2303_v31  ;;  %3525 = vmatprep.mubr.msk.bf16.mxu0 %vm3702_vm0, %v3701_v1 }
 0x3d4   :  { %v2200_v63 = vpack.c.bf16 %v2097_v62, %v2097_v62  ;;  %3535 = vmatprep.subr.bf16.mxu0 %v3701_v1 }
 0x3d5   :  { %v3468_v0 = vpop.f32.mrf.mxu0  ;;  %v3473_v2 = vpop.f32.mrf.mxu1 }
 0x3d6   :  { %3520 = vmatmul.mubr.msk.bf16.vlgmr.msra.gmra.mxu1 %vm1329_vm2, %v2200_v63 }
 0x3d7   :  { %v2100_v45 = vpop.f32.mrf.mxu1  ;;  %v2143_v3 = vpop.f32.mrf.mxu0  ;;  %3530 = vmatpush3.bf16.msra.mxu1 %v2349_v39  ;;  %3531 = vmatprep.mubr.msk.bf16.mxu1 %vm3702_vm0, %v3701_v1 }
 0x3d8   :  { %v2201_v5 = vpack.c.bf16 %v2143_v3, %v2143_v3  ;;  %3543 = vmatprep.subr.bf16.mxu1 %v3701_v1 }
 0x3d9   :  { %v3474_v6 = vpop.f32.mrf.mxu1  ;;  %v3479_v7 = vpop.f32.mrf.mxu0 }
 0x3da   :  { %3526 = vmatmul.mubr.msk.bf16.vlgmr.msra.gmra.mxu0 %vm1329_vm2, %v2201_v5  ;;  %v3605_v5 = vld [vmem:[%s4412_s12 + $0x8] sm:$0xff]   ;;  %v3606_v6 = vld [vmem:[%s4412_s12] sm:$0xff]  }
 0x3db   :  { %v2146_v41 = vpop.f32.mrf.mxu0  ;;  %v2189_v46 = vpop.f32.mrf.mxu1  ;;  %3539 = vmatprep.mubr.msk.bf16.mxu0 %vm3702_vm0, %v3701_v1  ;;  %3536 = vmatpush3.bf16.msra.mxu0 %v3605_v5 }
 0x3dc   :  { %v2202_v9 = vpack.c.bf16 %v2189_v46, %v2189_v46  ;;  %3537 = vmatprep.subr.bf16.mxu0 %v3701_v1 }
 0x3dd   :  { %v3480_v10 = vpop.f32.mrf.mxu0  ;;  %v3485_v11 = vpop.f32.mrf.mxu1 }
 0x3de   :  { %3532 = vmatmul.mubr.msk.bf16.vlgmr.msra.gmra.mxu1 %vm1329_vm2, %v2202_v9 }
 0x3df   :  { %v2192_v12 = vpop.f32.mrf.mxu1  ;;  %3547 = vmatprep.mubr.msk.bf16.mxu1 %vm3702_vm0, %v3701_v1  ;;  %3544 = vmatpush3.bf16.msra.mxu1 %v3605_v5 }
 0x3e0   :  { %3545 = vmatprep.subr.bf16.mxu1 %v3701_v1  ;;  %3538 = vmatpush3.bf16.msra.mxu0 %v3606_v6  ;;  %v3047_v12 = vld [vmem:[%s4410_s10] ss:$0 sm:$0xff] }
 0x3e1   :  { %v3486_v13 = vpop.f32.mrf.mxu1  ;;  %3551 = vmatprep.subr.bf16.mxu0 %v3701_v1 }
 0x3e3   :  { %3546 = vmatpush3.bf16.msra.mxu1 %v3606_v6 }
 0x3e4   :  { %3563 = vmatprep.subr.bf16.mxu1 %v3701_v1 }
 0x482   :  { %v2247_v37 = vpop.f32.mrf.mxu0 }
 0x484   :  { %v3491_v51 = vpop.f32.mrf.mxu0 }
 0x485   :  { %v3048_v51 = vld [vmem:[%s4411_s11] ss:$0 sm:$0xff] }
 0x486   :  { %v2250_v14 = vpop.f32.mrf.mxu0  ;;  %v2293_v15 = vpop.f32.mrf.mxu1 }
 0x487   :  { %v2563_v8 = vadd.f32 %v2293_v15, %v2247_v37 }
 0x488   :  { %v3492_v4 = vpop.f32.mrf.mxu0  ;;  %v3497_v16 = vpop.f32.mrf.mxu1 }
 0x489   :  { %v3655_v4 = vld [vmem:[%s4429_s26] sm:$0xff] }
 0x48a   :  { %v2296_v56 = vpop.f32.mrf.mxu1  ;;  %v2339_v54 = vpop.f32.mrf.mxu0 }
 0x48b   :  { %v2565_v18 = vadd.f32 %v2563_v8, %v2339_v54 }
 0x48c   :  { %v3498_v53 = vpop.f32.mrf.mxu1  ;;  %v3503_v17 = vpop.f32.mrf.mxu0 }
 0x48e   :  { %v2342_v19 = vpop.f32.mrf.mxu0  ;;  %v2385_v20 = vpop.f32.mrf.mxu1 }
 0x48f   :  { %v2567_v22 = vadd.f32 %v2565_v18, %v2385_v20  ;;  %v3656_v18 = vld [vmem:[%s4429_s26 + $0x8] sm:$0xff] }
 0x490   :  { %v3504_v23 = vpop.f32.mrf.mxu0  ;;  %v3509_v24 = vpop.f32.mrf.mxu1 }
 0x491   :  { %v2576_v25 = vadd.f32 %v3046_v21, %v2567_v22  ;;  %v3608_v22 = vld [vmem:[%s4414_s14 + $0x10] sm:$0xff]   ;;  %v3609_v23 = vld [vmem:[%s4414_s14 + $0x8] sm:$0xff]   ;;  %v3610_v24 = vld [vmem:[%s4414_s14] sm:$0xff]  }
 0x492   :  { %v2388_v26 = vpop.f32.mrf.mxu1  ;;  %v2428_v27 = vpop.f32.mrf.mxu0 }
 0x493   :  { %v2580_v28 = vsel %vm124_vm1, %v2576_v25, 0.0 }
 0x494   :  { %v3510_v31 = vpop.f32.mrf.mxu1  ;;  %2581 = vadd.xlane.f32.xlu0 %v2580_v28  ;;  %v3515_v32 = vpop.f32.mrf.mxu0 }
 0x496   :  { %v2431_v30 = vpop.f32.mrf.mxu0  ;;  %v2471_v33 = vpop.f32.mrf.mxu1 }
 0x497   :  { %v2564_v42 = vadd.f32 %v2471_v33, %v2428_v27 }
 0x498   :  { %v3516_v35 = vpop.f32.mrf.mxu0  ;;  %v3521_v36 = vpop.f32.mrf.mxu1 }
 0x49a   :  { %v2474_v39 = vpop.f32.mrf.mxu1  ;;  %v2514_v40 = vpop.f32.mrf.mxu0 }
 0x49b   :  { %v2566_v47 = vadd.f32 %v2564_v42, %v2514_v40 }
 0x49c   :  { %v3522_v43 = vpop.f32.mrf.mxu1  ;;  %v3527_v44 = vpop.f32.mrf.mxu0 }
 0x49e   :  { %v2517_v48 = vpop.f32.mrf.mxu0  ;;  %v2557_v49 = vpop.f32.mrf.mxu1 }
 0x49f   :  { %v2568_v50 = vadd.f32 %v2566_v47, %v2557_v49 }
 0x4a0   :  { %v3528_v52 = vpop.f32.mrf.mxu0  ;;  %v3533_v55 = vpop.f32.mrf.mxu1 }
 0x4a1   :  { %v2577_v38 = vadd.f32 %v3046_v21, %v2568_v50  ;;  %v3607_v21 = vld [vmem:[%s4414_s14 + $0x18] sm:$0xff]  }
 0x4a2   :  { %v2560_v57 = vpop.f32.mrf.mxu1 }
 0x4a3   :  { %v2583_v58 = vsel %vm124_vm1, %v2577_v38, 0.0 }
 0x4a4   :  { %v3534_v59 = vpop.f32.mrf.mxu1  ;;  %2584 = vadd.xlane.f32.xlu1 %v2583_v58 }
 0x51d   :  { %v2582_v29 = vpop.xlane.xlu0 %2581 }
 0x51e   :  { %v2587_v60 = vmul.f32 0.03125, %v2582_v29 }
 0x520   :  { %v2589_v61 = vsub.f32 %v2576_v25, %v2587_v60  ;;  %v3049_v25 = vld [vmem:[%s4413_s13] ss:$0 sm:$0xff] }
 0x522   :  { %v2591_v34 = vmul.f32 %v2589_v61, %v2589_v61 }
 0x524   :  { %v2593_v62 = vsel %vm124_vm1, %v2591_v34, 0.0 }
 0x525   :  { %2594 = vadd.xlane.f32.xlu0 %v2593_v62 }
 0x52d   :  { %v2585_v63 = vpop.xlane.xlu1 %2584 }
 0x52e   :  { %v2588_v0 = vmul.f32 0.03125, %v2585_v63  ;;  %v3054_v63 = vld [vmem:[%s4415_s15] ss:$0 sm:$0xff]  ;;  %s3703_s15 = smov [#allocation4]  }
 0x52f   :  { %s2947_s8 = sshll.u32 %s3703_s15, 4  ;;  %s2948_s8 = int_to_ptr.vmem [resolvable:$true] %s2947_s8 }
 0x530   :  { %v2590_v2 = vsub.f32 %v2577_v38, %v2588_v0  ;;  %s3657_s29 = scalar_lea.vmem %s2948_s8, 1024  ;;  %p3662_p1 = scmp.lt.s32.totalorder %s2948_s8, %s2948_s8 }
 0x531   :  { %p3658_p0 = scmp.ne.s32.totalorder %s2948_s8, %s3657_s29  ;;  %p3663_p2 = scmp.lt.s32.totalorder %s3657_s29, %s3657_s29 }
 0x532   :  { %v2592_v45 = vmul.f32 %v2590_v2, %v2590_v2 }
 0x533   :  { %p3664_p3 = por %p3663_p2, %p3662_p1 }
 0x534   :  { %v2596_v3 = vsel %vm124_vm1, %v2592_v45, 0.0 }
 0x535   :  { %2597 = vadd.xlane.f32.xlu1 %v2596_v3  ;;  %p3665_p4 = pnand %p3664_p3, %p3658_p0 }
 0x5ae   :  { %v2595_v7 = vpop.xlane.xlu0 %2594 }
 0x5af   :  { %v2599_v41 = vmul.f32 0.03125, %v2595_v7 }
 0x5b1   :  { %v2601_v46 = vadd.f32 1e-05, %v2599_v41 }
 0x5b3   :  { %3643 = vrsqrt.f32 %v2601_v46 }
 0x5be   :  { %v2598_v9 = vpop.xlane.xlu1 %2597 }
 0x5bf   :  { %v2600_v10 = vmul.f32 0.03125, %v2598_v9 }
 0x5c0   :  { %v3644_v11 = vpop.eup %3643 }
 0x5c1   :  { %v2605_v13 = vmul.f32 %v3644_v11, %v2589_v61  ;;  %v2602_v37 = vadd.f32 1e-05, %v2600_v10 }
 0x5c3   :  { %v2613_v14 = vmul.f32 %v3047_v12, %v2605_v13  ;;  %3645 = vrsqrt.f32 %v2602_v37 }
 0x5c5   :  { %v2621_v15 = vadd.f32 %v3048_v51, %v2613_v14 }
 0x5c7   :  { %v4333_v16 = vadd.f32 %v3655_v4, %v2621_v15 }
 0x5c9   :  { %v2637_v56 = vpack.c.bf16 %v4333_v16, %v4333_v16 }
 0x5cb   :  { %3540 = vmatmul.mubr.msk.bf16.vlgmr.msra.gmra.mxu0 %vm124_vm1, %v2637_v56 }
 0x5cc   :  { %3559 = vmatprep.mubr.msk.bf16.mxu0 %vm3702_vm0, %v3701_v1  ;;  %3552 = vmatpush3.bf16.msra.mxu0 %v3607_v21 }
 0x5cd   :  { %3553 = vmatprep.subr.bf16.mxu0 %v3701_v1 }
 0x5d0   :  { %v3646_v54 = vpop.eup %3645  ;;  %3554 = vmatpush3.bf16.msra.mxu0 %v3608_v22 }
 0x5d1   :  { %v2606_v8 = vmul.f32 %v3646_v54, %v2590_v2  ;;  %3555 = vmatprep.subr.bf16.mxu0 %v3701_v1 }
 0x5d3   :  { %v2614_v53 = vmul.f32 %v3047_v12, %v2606_v8 }
 0x5d4   :  { %3556 = vmatpush3.bf16.msra.mxu0 %v3609_v23 }
 0x5d5   :  { %v2622_v17 = vadd.f32 %v3048_v51, %v2614_v53  ;;  %3557 = vmatprep.subr.bf16.mxu0 %v3701_v1 }
 0x5d7   :  { %v4343_v19 = vadd.f32 %v3656_v18, %v2622_v17 }
 0x5d8   :  { %3558 = vmatpush3.bf16.msra.mxu0 %v3610_v24 }
 0x5d9   :  { %v2638_v20 = vpack.c.bf16 %v4343_v19, %v4343_v19 }
 0x5db   :  { %3548 = vmatmul.mubr.msk.bf16.vlgmr.msra.gmra.mxu1 %vm124_vm1, %v2638_v20 }
 0x5dc   :  { %3571 = vmatprep.mubr.msk.bf16.mxu1 %vm3702_vm0, %v3701_v1  ;;  %3564 = vmatpush3.bf16.msra.mxu1 %v3607_v21 }
 0x5dd   :  { %3565 = vmatprep.subr.bf16.mxu1 %v3701_v1 }
 0x5e0   :  { %3566 = vmatpush3.bf16.msra.mxu1 %v3608_v22 }
 0x5e1   :  { %3567 = vmatprep.subr.bf16.mxu1 %v3701_v1 }
 0x5e4   :  { %3568 = vmatpush3.bf16.msra.mxu1 %v3609_v23 }
 0x5e5   :  { %3569 = vmatprep.subr.bf16.mxu1 %v3701_v1 }
 0x5e8   :  { %3570 = vmatpush3.bf16.msra.mxu1 %v3610_v24 }
 0x68b   :  { %v2695_v26 = vpop.f32.mrf.mxu0 }
 0x68c   :  { %v2696_v27 = vadd.f32 %v3049_v25, %v2695_v26 }
 0x68d   :  { %v3541_v28 = vpop.f32.mrf.mxu0 }
 0x68e   :  { %v2746_v31 = vmul.f32 0.044715, %v2696_v27  ;;  %v2744_v55 = vmul.f32 0.5, %v2696_v27 }
 0x68f   :  { %v2698_v32 = vpop.f32.mrf.mxu0 }
 0x690   :  { %v2748_v30 = vmul.f32 %v2746_v31, %v2696_v27 }
 0x691   :  { %v3542_v33 = vpop.f32.mrf.mxu0 }
 0x692   :  { %v2750_v35 = vmul.f32 %v2748_v30, %v2696_v27 }
 0x694   :  { %v2752_v36 = vadd.f32 %v2750_v35, %v2696_v27 }
 0x696   :  { %v2754_v1 = vmul.f32 0.7978846, %v2752_v36 }
 0x698   :  { %3647 = vtanh.f32 %v2754_v1 }
 0x69b   :  { %v2738_v39 = vpop.f32.mrf.mxu1 }
 0x69c   :  { %v2739_v40 = vadd.f32 %v3049_v25, %v2738_v39 }
 0x69d   :  { %v3549_v42 = vpop.f32.mrf.mxu1 }
 0x69e   :  { %v2747_v43 = vmul.f32 0.044715, %v2739_v40  ;;  %v2745_v60 = vmul.f32 0.5, %v2739_v40 }
 0x69f   :  { %v2741_v44 = vpop.f32.mrf.mxu1 }
 0x6a0   :  { %v2749_v47 = vmul.f32 %v2747_v43, %v2739_v40 }
 0x6a1   :  { %v3550_v48 = vpop.f32.mrf.mxu1 }
 0x6a2   :  { %v2751_v49 = vmul.f32 %v2749_v47, %v2739_v40 }
 0x6a4   :  { %v2753_v50 = vadd.f32 %v2751_v49, %v2739_v40 }
 0x6a5   :  { %v3648_v52 = vpop.eup %3647 }
 0x6a6   :  { %v2755_v38 = vmul.f32 0.7978846, %v2753_v50  ;;  %v2758_v57 = vadd.f32 1.0, %v3648_v52 }
 0x6a8   :  { %3649 = vtanh.f32 %v2755_v38  ;;  %v2760_v58 = vmul.f32 %v2758_v57, %v2744_v55 }
 0x6aa   :  { %v2762_v59 = vpack.c.bf16 %v2760_v58, %v2760_v58 }
 0x6ac   :  { %3560 = vmatmul.mubr.msk.bf16.vlgmr.msra.gmra.mxu0 %vm2795_vm4, %v2762_v59 }
 0x6b5   :  { %v3650_v29 = vpop.eup %3649 }
 0x6b6   :  { %v2759_v61 = vadd.f32 1.0, %v3650_v29 }
 0x6b8   :  { %v2761_v34 = vmul.f32 %v2759_v61, %v2745_v60 }
 0x6ba   :  { %v2763_v62 = vpack.c.bf16 %v2761_v34, %v2761_v34 }
 0x6bc   :  { %3572 = vmatmul.mubr.msk.bf16.vlgmr.msra.gmra.mxu1 %vm2795_vm4, %v2763_v62 }
 0x76c   :  { %v2833_v0 = vpop.f32.mrf.mxu0 }
 0x76d   :  { %v2834_v2 = vadd.f32 %v3054_v63, %v2833_v0 }
 0x76e   :  { %v3561_v45 = vpop.f32.mrf.mxu0 }
 0x76f   :  { %v2884_v3 = vsel %vm124_vm1, %v2834_v2, 0.0 }
 0x770   :  { %2885 = vadd.xlane.f32.xlu0 %v2884_v3  ;;  %v2836_v5 = vpop.f32.mrf.mxu0 }
 0x772   :  { %v3562_v6 = vpop.f32.mrf.mxu0 }
 0x77c   :  { %v2876_v7 = vpop.f32.mrf.mxu1 }
 0x77d   :  { %v2877_v41 = vadd.f32 %v3054_v63, %v2876_v7 }
 0x77e   :  { %v3573_v46 = vpop.f32.mrf.mxu1 }
 0x77f   :  { %v2887_v9 = vsel %vm124_vm1, %v2877_v41, 0.0 }
 0x780   :  { %2888 = vadd.xlane.f32.xlu1 %v2887_v9  ;;  %v2879_v10 = vpop.f32.mrf.mxu1 }
 0x782   :  { %v3574_v11 = vpop.f32.mrf.mxu1 }
 0x7f9   :  { %v2886_v12 = vpop.xlane.xlu0 %2885 }
 0x7fa   :  { %v2890_v13 = vmul.f32 0.03125, %v2886_v12 }
 0x7fc   :  { %v2892_v37 = vsub.f32 %v2834_v2, %v2890_v13 }
 0x7fe   :  { %v2894_v51 = vmul.f32 %v2892_v37, %v2892_v37 }
 0x800   :  { %v2896_v14 = vsel %vm124_vm1, %v2894_v51, 0.0 }
 0x801   :  { %2897 = vadd.xlane.f32.xlu0 %v2896_v14 }
 0x809   :  { %v2889_v15 = vpop.xlane.xlu1 %2888 }
 0x80a   :  { %v2891_v4 = vmul.f32 0.03125, %v2889_v15 }
 0x80c   :  { %v2893_v56 = vsub.f32 %v2877_v41, %v2891_v4 }
 0x80e   :  { %v2895_v54 = vmul.f32 %v2893_v56, %v2893_v56 }
 0x810   :  { %v2899_v8 = vsel %vm124_vm1, %v2895_v54, 0.0 }
 0x811   :  { %2900 = vadd.xlane.f32.xlu1 %v2899_v8 }
 0x812   :  { %3668 = shalt.err (!%p3665_p4)
}
 0x813   :  { %s3704_s9 = smov 128   ;;  %s3705_s0 = smov 8   ;;  %v3061_v23 = vld [vmem:[%s4416_s16] ss:$0 sm:$0xff] }
 0x814   :  { %2953 = dma.vmem_to_hbm [thread:$0]  %s2948_s8, 1024, %s4419_s19, [#allocation5], %s3704_s9, %s3704_s9, %s3705_s0  }
 0x815   :  { %v3062_v26 = vld [vmem:[%s4417_s17] ss:$0 sm:$0xff]  ;;  %s3706_s19 = smov [#allocation2]  }
 0x816   :  { %s2935_s23 = sshll.u32 %s3706_s19, 4  ;;  %s2936_s23 = int_to_ptr.vmem [resolvable:$true] %s2935_s23 }
 0x817   :  { %s3677_s16 = scalar_lea.vmem %s2936_s23, 256  ;;  %p3682_p6 = scmp.lt.s32.totalorder %s2936_s23, %s2936_s23 }
 0x818   :  { %p3678_p5 = scmp.ne.s32.totalorder %s2936_s23, %s3677_s16  ;;  %p3683_p7 = scmp.lt.s32.totalorder %s3677_s16, %s3677_s16 }
 0x81a   :  { %p3684_p8 = por %p3683_p7, %p3682_p6 }
 0x81c   :  { %p3685_p9 = pnand %p3684_p8, %p3678_p5 }
 0x88a   :  { %v2898_v53 = vpop.xlane.xlu0 %2897 }
 0x88b   :  { %v2902_v17 = vmul.f32 0.03125, %v2898_v53 }
 0x88d   :  { %v2904_v18 = vadd.f32 1e-05, %v2902_v17 }
 0x88f   :  { %3651 = vrsqrt.f32 %v2904_v18 }
 0x89a   :  { %v2901_v20 = vpop.xlane.xlu1 %2900 }
 0x89b   :  { %v2903_v21 = vmul.f32 0.03125, %v2901_v20 }
 0x89c   :  { %v3652_v22 = vpop.eup %3651 }
 0x89d   :  { %v2905_v24 = vadd.f32 1e-05, %v2903_v21  ;;  %v2908_v25 = vmul.f32 %v3652_v22, %v2892_v37 }
 0x89f   :  { %3653 = vrsqrt.f32 %v2905_v24  ;;  %v2916_v27 = vmul.f32 %v3061_v23, %v2908_v25 }
 0x8a1   :  { %v2924_v28 = vadd.f32 %v3062_v26, %v2916_v27 }
 0x8a3   :  { %v2926_v31 = vadd.f32 %v2924_v28, %v4333_v16 }
 0x8a5   :  { %2928 = vst.msk [vmem:[#allocation2] sm:$0xff] %vm124_vm1, %v2926_v31 }
 0x8ac   :  { %v3654_v32 = vpop.eup %3653 }
 0x8ad   :  { %v2909_v30 = vmul.f32 %v3654_v32, %v2893_v56 }
 0x8af   :  { %v2917_v33 = vmul.f32 %v3061_v23, %v2909_v30 }
 0x8b1   :  { %v2925_v35 = vadd.f32 %v3062_v26, %v2917_v33 }
 0x8b3   :  { %v2927_v36 = vadd.f32 %v2925_v35, %v4343_v19 }
 0x8b5   :  { %2929 = vst.msk [vmem:[#allocation2 + $0x8] sm:$0xff] %vm124_vm1, %v2927_v36 }
 0x8b6   :  { %3688 = shalt.err (!%p3685_p9)
}
 0x8b7   :  { %2941 = dma.vmem_to_hbm [thread:$0]  %s2936_s23, 256, %s4418_s18, [#allocation3], %s3704_s9, %s3704_s9, %s3705_s0  }
 0x8b8   :  { %3697 = dma.done.wait [#allocation3], 256  }
 0x8b9   :  { %3698 = vsyncadd [#allocation3], 4294967040 }
 0x8ba   :  { %3699 = dma.done.wait [#allocation5], 1024  }
 0x8bb   :  { %3700 = vsyncadd [#allocation5], 4294966272 }
 0x8bc   :  { %2960 = vsyncpa [#allocation3], 1 }
 0x8bd   :  { %2961 = vsyncpa [#allocation5], 1 }

</bundles_post_ra>
